<compile_context>
chip_gen: v5e
topology: v5e:2x2
jax: 0.10.0
libtpu: 0.0.40
codegen_flags: <defaults>
</compile_context>

<pallas_src>
import math
import numpy as np
import jax
import jax.numpy as jnp
from jax import lax
from jax.experimental import pallas as pl
from jax.experimental.pallas import tpu as pltpu

# ---------------- config (small, consistent with the module) ----------------
B = 2                      # batch
C = 4                      # input channels
IMG = 16                   # image H = W
PATCH = 4                  # patch size
GRID = IMG // PATCH        # 4
N_PATCH = GRID * GRID      # 16
D = 32                     # hidden size
N_HEADS = 4
HEAD_DIM = D // N_HEADS    # 8
N_LAYERS = 2
D_FF = 64                  # intermediate size
MASK_RATIO = 0.75
LEN_KEEP = int(N_PATCH * (1.0 - MASK_RATIO))   # 4
SEQ = LEN_KEEP + 1                             # 5 (CLS + kept patches)
EPS = 1e-12                # HF ViTMAE layer_norm_eps
ATTN_SCALE = 1.0 / math.sqrt(HEAD_DIM)
NEG_INF = -1e30            # additive mask for cross-batch attention scores

# MXU operand dtype / parameter-slab storage dtype.
# f32 keeps exact reference numerics and is the right choice on v5e.
# On v6e/v7x flip BOTH to jnp.bfloat16 (halves weight DMA, native MXU path).
MXU_DTYPE = jnp.float32
PARAM_DTYPE = jnp.float32

DATA_COLS = C * PATCH * PATCH          # 64   (flattened patch width)
DATA_ROWS = B * N_PATCH + B * SEQ      # 42   (patches + selection matrix)
PARAM_COLS = 3 * D                     # 96   (widest block: fused QKV weight)
_ALIGN = 8                             # sublane alignment for slab blocks


# ------------------------- packed parameter slab layout ----------------------
def _param_layout():
    """Static (row_start, rows, cols) for every block in the single param slab."""
    layout = {}
    r = 0

    def add(name, rows, cols):
        nonlocal r
        r = ((r + _ALIGN - 1) // _ALIGN) * _ALIGN     # 8-align every block start
        layout[name] = (r, rows, cols)
        r += rows

    add("patch_w", C * PATCH * PATCH, D)              # (64, 32) patch-embed weight
    add("pos_bias", B * N_PATCH, D)                   # batch-tiled pos emb + conv bias
    add("cls_rows", B * SEQ, D)                       # (cls + pos[0]) at CLS rows, else 0
    add("attn_mask", B * SEQ, B * SEQ)                # block-diag 0 / -1e30 batch mask
    for l in range(N_LAYERS):
        add(f"ln1g_{l}", 1, D)
        add(f"ln1b_{l}", 1, D)
        add(f"wqkv_{l}", D, 3 * D)
        add(f"bqkv_{l}", 1, 3 * D)
        add(f"wo_{l}", D, D)
        add(f"bo_{l}", 1, D)
        add(f"ln2g_{l}", 1, D)
        add(f"ln2b_{l}", 1, D)
        add(f"w1_{l}", D, D_FF)
        add(f"c1_{l}", 1, D_FF)
        add(f"w2_{l}", D_FF, D)
        add(f"c2_{l}", 1, D)
    add("lng", 1, D)
    add("lnb", 1, D)

    r = ((r + _ALIGN - 1) // _ALIGN) * _ALIGN
    return layout, r


PARAM_LAYOUT, PARAM_ROWS = _param_layout()


# ----------------------- in-kernel math helpers ------------------------------
def _layernorm(v, g, b):
    mu = jnp.mean(v, axis=-1, keepdims=True)
    var = jnp.mean(jnp.square(v - mu), axis=-1, keepdims=True)
    return (v - mu) * lax.rsqrt(var + EPS) * g + b


def _mm(a, w):
    return jnp.dot(a.astype(MXU_DTYPE), w.astype(MXU_DTYPE),
                   preferred_element_type=jnp.float32)


def _mm_t(a, b):
    # (q, d) x (k, d) -> (q, k), contraction on the last dim of both operands
    return lax.dot_general(a.astype(MXU_DTYPE), b.astype(MXU_DTYPE),
                           (((1,), (1,)), ((), ())),
                           preferred_element_type=jnp.float32)


def _erf(x):
    # Abramowitz & Stegun 7.1.26 rational approximation, |abs err| < 1.5e-7.
    # Keeps HF's erf-exact GELU semantics using only exp/div/abs (safe Mosaic ops).
    a1, a2, a3, a4, a5 = 0.254829592, -0.284496736, 1.421413741, -1.453152027, 1.061405429
    p = 0.3275911
    sgn = jnp.where(x >= 0.0, 1.0, -1.0)
    ax = jnp.abs(x)
    t = 1.0 / (1.0 + p * ax)
    poly = ((((a5 * t + a4) * t + a3) * t + a2) * t + a1) * t
    return sgn * (1.0 - poly * jnp.exp(-ax * ax))


def _gelu(x):
    return 0.5 * x * (1.0 + _erf(x * (1.0 / math.sqrt(2.0))))


def _get(p_ref, name):
    r0, rows, cols = PARAM_LAYOUT[name]
    return p_ref[r0:r0 + rows, 0:cols]


# ----------------------------- fused kernel ----------------------------------
def _fused_vit_kernel(data_ref, p_ref, o_ref):
    """Entire encoder forward for the whole batch in one grid-less invocation."""

    def P(name):
        return _get(p_ref, name)

    flat = data_ref[0:B * N_PATCH, :]                              # (B*N, Cpp)
    sel = data_ref[B * N_PATCH:DATA_ROWS, 0:B * N_PATCH]           # (B*SEQ, B*N)

    # (1-2) patch embedding + (batch-tiled pos-embed + conv bias)
    emb = _mm(flat, P("patch_w")) + P("pos_bias")                  # (B*N, D)

    # (3-4) masking gather + CLS prepend, both folded into one selection matmul
    #       plus a precomputed CLS-rows add -> one (B*SEQ, D) activation slab.
    x = _mm(sel, emb) + P("cls_rows")                              # (B*SEQ, D)

    # block-diagonal additive mask: cross-batch scores -> -1e30 -> 0 attention
    neg_mask = P("attn_mask").astype(jnp.float32)                  # (B*SEQ, B*SEQ)

    # (5) transformer layers (pre-LN), static unroll over layers / heads
    for l in range(N_LAYERS):
        # ---- attention block ----
        xn = _layernorm(x, P(f"ln1g_{l}"), P(f"ln1b_{l}"))
        qkv = _mm(xn, P(f"wqkv_{l}")) + P(f"bqkv_{l}")             # (B*SEQ, 3D)

        ctx_heads = []
        for h in range(N_HEADS):
            qh = qkv[:, h * HEAD_DIM:(h + 1) * HEAD_DIM]
            kh = qkv[:, D + h * HEAD_DIM:D + (h + 1) * HEAD_DIM]
            vh = qkv[:, 2 * D + h * HEAD_DIM:2 * D + (h + 1) * HEAD_DIM]
            s = _mm_t(qh, kh) * ATTN_SCALE + neg_mask              # (B*SEQ, B*SEQ)
            s = s - jnp.max(s, axis=-1, keepdims=True)
            p = jnp.exp(s)
            p = p * pl.reciprocal(jnp.sum(p, axis=-1, keepdims=True), approx=True)
            ctx_heads.append(_mm(p, vh))                           # (B*SEQ, HD)

        ctx = jnp.concatenate(ctx_heads, axis=-1)                  # (B*SEQ, D)
        h1 = x + _mm(ctx, P(f"wo_{l}")) + P(f"bo_{l}")             # residual

        # ---- MLP block ----
        hn = _layernorm(h1, P(f"ln2g_{l}"), P(f"ln2b_{l}"))
        f = _mm(hn, P(f"w1_{l}")) + P(f"c1_{l}")
        f = _gelu(f)                                               # erf-exact GELU
        x = h1 + _mm(f, P(f"w2_{l}")) + P(f"c2_{l}")               # residual

    # (6) final LayerNorm on the CLS row of each sequence -> (B, D)
    #     (LN is per-token, so select-then-LN == LN-then-select)
    cls_out = jnp.concatenate([x[b * SEQ:b * SEQ + 1, :] for b in range(B)], axis=0)
    o_ref[...] = _layernorm(cls_out, P("lng"), P("lnb")).astype(o_ref.dtype)


# --------------------------- parameter construction --------------------------
def _sincos_1d(embed_dim, pos):
    omega = np.arange(embed_dim // 2, dtype=np.float64) / (embed_dim / 2.0)
    omega = 1.0 / 10000.0 ** omega
    out = np.einsum("m,d->md", pos.reshape(-1).astype(np.float64), omega)
    return np.concatenate([np.sin(out), np.cos(out)], axis=1)


def _sincos_2d_pos_embed(embed_dim, grid_size):
    gh = np.arange(grid_size, dtype=np.float32)
    gw = np.arange(grid_size, dtype=np.float32)
    grid = np.meshgrid(gw, gh)                       # w first (MAE convention)
    grid = np.stack(grid, axis=0).reshape(2, 1, grid_size, grid_size)
    emb_h = _sincos_1d(embed_dim // 2, grid[0])
    emb_w = _sincos_1d(embed_dim // 2, grid[1])
    pos = np.concatenate([emb_h, emb_w], axis=1)     # (N, D)
    pos = np.concatenate([np.zeros((1, embed_dim)), pos], axis=0)  # + CLS slot
    return pos[None].astype(np.float32)              # (1, 1+N, D)


def _pack_param_slab(tensors):
    slab = np.zeros((PARAM_ROWS, PARAM_COLS), dtype=np.float32)
    for name, (r0, rows, cols) in PARAM_LAYOUT.items():
        t = np.asarray(tensors[name], dtype=np.float32)
        assert t.shape == (rows, cols), (name, t.shape, (rows, cols))
        slab[r0:r0 + rows, 0:cols] = t
    return jnp.asarray(slab, dtype=PARAM_DTYPE)


def init_params(key):
    cnt = [0]

    def nxt():
        cnt[0] += 1
        return jax.random.fold_in(key, cnt[0])

    def nrm(shape, scale=0.02):
        return (scale * jax.random.normal(nxt(), shape)).astype(jnp.float32)

    tensors = {}

    # patch embedding: Conv2d(C, D, P, P) flattened to a matmul
    conv_w = nrm((D, C, PATCH, PATCH))
    tensors["patch_w"] = conv_w.reshape(D, C * PATCH * PATCH).T          # (Cpp, D)
    patch_b = nrm((1, D))

    pos = jnp.asarray(_sincos_2d_pos_embed(D, GRID))                     # (1, 1+N, D)
    # fixed pos embeddings, pre-tiled over batch, with the conv bias folded in
    tensors["pos_bias"] = jnp.tile(pos[0, 1:, :], (B, 1)) + patch_b      # (B*N, D)

    cls_token = nrm((1, D))
    cls_plus = cls_token + pos[0, 0:1, :]                                # (1, D)
    cls_rows = jnp.zeros((B * SEQ, D), jnp.float32)
    cls_rows = cls_rows.at[jnp.arange(B) * SEQ].set(jnp.broadcast_to(cls_plus, (B, D)))
    tensors["cls_rows"] = cls_rows                                       # (B*SEQ, D)

    bid = np.repeat(np.arange(B), SEQ)
    tensors["attn_mask"] = jnp.asarray(
        np.where(bid[:, None] == bid[None, :], 0.0, NEG_INF).astype(np.float32))

    for l in range(N_LAYERS):
        tensors[f"ln1g_{l}"] = jnp.ones((1, D), jnp.float32)
        tensors[f"ln1b_{l}"] = nrm((1, D))
        wq, bq = nrm((D, D)), nrm((1, D))
        wk, bk = nrm((D, D)), nrm((1, D))
        wv, bv = nrm((D, D)), nrm((1, D))
        tensors[f"wqkv_{l}"] = jnp.concatenate([wq, wk, wv], axis=1)     # (D, 3D)
        tensors[f"bqkv_{l}"] = jnp.concatenate([bq, bk, bv], axis=1)     # (1, 3D)
        tensors[f"wo_{l}"] = nrm((D, D))
        tensors[f"bo_{l}"] = nrm((1, D))
        tensors[f"ln2g_{l}"] = jnp.ones((1, D), jnp.float32)
        tensors[f"ln2b_{l}"] = nrm((1, D))
        tensors[f"w1_{l}"] = nrm((D, D_FF))
        tensors[f"c1_{l}"] = nrm((1, D_FF))
        tensors[f"w2_{l}"] = nrm((D_FF, D))
        tensors[f"c2_{l}"] = nrm((1, D))

    tensors["lng"] = jnp.ones((1, D), jnp.float32)
    tensors["lnb"] = nrm((1, D))

    return {"slab": _pack_param_slab(tensors),
            # masking noise key frozen at init -> deterministic proxy masking
            "mask_key": nxt()}


# ------------------------------ forward pass ---------------------------------
def _make_data_slab(x, mask_key):
    """Patchify + build the masking/CLS selection matrix; pack as one slab."""
    xp = x.reshape(B, C, GRID, PATCH, GRID, PATCH)
    xp = xp.transpose(0, 2, 4, 1, 3, 5)                  # B, gh, gw, C, p, p
    flat = xp.reshape(B * N_PATCH, C * PATCH * PATCH).astype(jnp.float32)

    # ViTMAE random masking (argsort noise, keep first len_keep), expressed as a
    # block-diagonal (B*SEQ, B*N_PATCH) selection matrix (CLS rows are zero).
    noise = jax.random.uniform(mask_key, (B, N_PATCH))
    ids_keep = jnp.argsort(noise, axis=1)[:, :LEN_KEEP]                  # (B, keep)
    oh = jax.nn.one_hot(ids_keep, N_PATCH, dtype=jnp.float32)            # (B, keep, N)
    sel_blocks = []
    for b in range(B):
        blk = jnp.zeros((SEQ, B * N_PATCH), jnp.float32)
        blk = blk.at[1:, b * N_PATCH:(b + 1) * N_PATCH].set(oh[b])
        sel_blocks.append(blk)
    sel = jnp.concatenate(sel_blocks, axis=0)                            # (B*SEQ, B*N)
    sel = jnp.pad(sel, ((0, 0), (0, DATA_COLS - B * N_PATCH)))           # pad to width 64
    return jnp.concatenate([flat, sel], axis=0)                          # (42, 64)


def proxy_model_forward(x, params):
    """x: NCHW [B, C, IMG, IMG] -> CLS embedding [B, D] (one fused pallas_call)."""
    data = _make_data_slab(x, params["mask_key"])

    flops = 2 * (B * N_PATCH * C * PATCH * PATCH * D                    # patch embed
                 + B * SEQ * B * N_PATCH * D                            # select matmul
                 + N_LAYERS * (B * SEQ * D * 3 * D                      # fused qkv
                               + 2 * N_HEADS * (B * SEQ) ** 2 * HEAD_DIM  # scores+ctx
                               + B * SEQ * D * D                        # out proj
                               + 2 * B * SEQ * D * D_FF))               # mlp
    transcendentals = N_LAYERS * (N_HEADS * (B * SEQ) ** 2 + 2 * B * SEQ * D_FF)
    bytes_accessed = (DATA_ROWS * DATA_COLS * 4
                      + PARAM_ROWS * PARAM_COLS * jnp.dtype(PARAM_DTYPE).itemsize
                      + B * D * 4)

    return pl.pallas_call(
        _fused_vit_kernel,
        out_shape=jax.ShapeDtypeStruct((B, D), jnp.float32),
        in_specs=[pl.BlockSpec(memory_space=pltpu.MemorySpace.VMEM),
                  pl.BlockSpec(memory_space=pltpu.MemorySpace.VMEM)],
        out_specs=pl.BlockSpec(memory_space=pltpu.MemorySpace.VMEM),
        cost_estimate=pl.CostEstimate(flops=flops,
                                      transcendentals=transcendentals,
                                      bytes_accessed=bytes_accessed),
    )(data, params["slab"])


# ----------------------------------- main -------------------------------------
if __name__ == "__main__":
    key = jax.random.PRNGKey(0)
    k_param, k_x = jax.random.split(key)
    params = init_params(k_param)
    x = jax.random.normal(k_x, (B, C, IMG, IMG), dtype=jnp.float32)

    fwd = jax.jit(proxy_model_forward)
    out = jax.block_until_ready(fwd(x, params))
    assert out.shape == (B, D) and out.dtype == jnp.float32
    print("KERNEL_OK")
</pallas_src>

<mosaic_0001>
module attributes {stable_mosaic.version = 11 : i64} {
  func.func @_fused_vit_kernel(%arg0: memref<42x64xf32, #tpu.memory_space<vmem>>, %arg1: memref<592x96xf32, #tpu.memory_space<vmem>>, %arg2: memref<2x32xf32, #tpu.memory_space<vmem>>) attributes {dimension_semantics = [], scalar_prefetch = 0 : i64, scratch_operands = 0 : i64, tpu.core_type = #tpu.core_type<tc>} {
    %c0 = arith.constant 0 : index
    %c0_0 = arith.constant 0 : index
    %0 = vector.load %arg0[%c0, %c0_0] : memref<42x64xf32, #tpu.memory_space<vmem>>, vector<32x64xf32>
    %c32 = arith.constant 32 : index
    %c0_1 = arith.constant 0 : index
    %1 = vector.load %arg0[%c32, %c0_1] : memref<42x64xf32, #tpu.memory_space<vmem>>, vector<10x32xf32>
    %c0_2 = arith.constant 0 : index
    %c0_3 = arith.constant 0 : index
    %2 = vector.load %arg1[%c0_2, %c0_3] : memref<592x96xf32, #tpu.memory_space<vmem>>, vector<64x32xf32>
    %cst = arith.constant dense<0.000000e+00> : vector<32x32xf32>
    %3 = tpu.matmul %0, %2, %cst {dimension_numbers = #tpu.dot_dimension_numbers<[1], [0], [0], [1], [0, 0, 1, 1], [], []>} : vector<32x64xf32>, vector<64x32xf32>, vector<32x32xf32> -> vector<32x32xf32>
    %c64 = arith.constant 64 : index
    %c0_4 = arith.constant 0 : index
    %4 = vector.load %arg1[%c64, %c0_4] : memref<592x96xf32, #tpu.memory_space<vmem>>, vector<32x32xf32>
    %5 = arith.addf %3, %4 : vector<32x32xf32>
    %cst_5 = arith.constant dense<0.000000e+00> : vector<10x32xf32>
    %6 = tpu.matmul %1, %5, %cst_5 {dimension_numbers = #tpu.dot_dimension_numbers<[1], [0], [0], [1], [0, 0, 1, 1], [], []>} : vector<10x32xf32>, vector<32x32xf32>, vector<10x32xf32> -> vector<10x32xf32>
    %c96 = arith.constant 96 : index
    %c0_6 = arith.constant 0 : index
    %7 = vector.load %arg1[%c96, %c0_6] : memref<592x96xf32, #tpu.memory_space<vmem>>, vector<10x32xf32>
    %8 = arith.addf %6, %7 : vector<10x32xf32>
    %c112 = arith.constant 112 : index
    %c0_7 = arith.constant 0 : index
    %9 = vector.load %arg1[%c112, %c0_7] : memref<592x96xf32, #tpu.memory_space<vmem>>, vector<10x10xf32>
    %c128 = arith.constant 128 : index
    %c0_8 = arith.constant 0 : index
    %10 = vector.load %arg1[%c128, %c0_8] : memref<592x96xf32, #tpu.memory_space<vmem>>, vector<1x32xf32>
    %c136 = arith.constant 136 : index
    %c0_9 = arith.constant 0 : index
    %11 = vector.load %arg1[%c136, %c0_9] : memref<592x96xf32, #tpu.memory_space<vmem>>, vector<1x32xf32>
    %cst_10 = arith.constant dense<0.000000e+00> : vector<10xf32>
    %12 = vector.multi_reduction <add>, %8, %cst_10 [1] : vector<10x32xf32> to vector<10xf32>
    %13 = vector.shape_cast %12 : vector<10xf32> to vector<10x1xf32>
    %cst_11 = arith.constant 3.200000e+01 : f32
    %14 = vector.broadcast %cst_11 : f32 to vector<10x1xf32>
    %15 = arith.divf %13, %14 : vector<10x1xf32>
    %16 = vector.broadcast %15 : vector<10x1xf32> to vector<10x32xf32>
    %17 = arith.subf %8, %16 : vector<10x32xf32>
    %18 = arith.mulf %17, %17 : vector<10x32xf32>
    %cst_12 = arith.constant dense<0.000000e+00> : vector<10xf32>
    %19 = vector.multi_reduction <add>, %18, %cst_12 [1] : vector<10x32xf32> to vector<10xf32>
    %20 = vector.shape_cast %19 : vector<10xf32> to vector<10x1xf32>
    %cst_13 = arith.constant 3.200000e+01 : f32
    %21 = vector.broadcast %cst_13 : f32 to vector<10x1xf32>
    %22 = arith.divf %20, %21 : vector<10x1xf32>
    %23 = vector.broadcast %15 : vector<10x1xf32> to vector<10x32xf32>
    %24 = arith.subf %8, %23 : vector<10x32xf32>
    %cst_14 = arith.constant 9.99999996E-13 : f32
    %25 = vector.broadcast %cst_14 : f32 to vector<10x1xf32>
    %26 = arith.addf %22, %25 : vector<10x1xf32>
    %27 = math.rsqrt %26 : vector<10x1xf32>
    %28 = vector.broadcast %27 : vector<10x1xf32> to vector<10x32xf32>
    %29 = arith.mulf %24, %28 : vector<10x32xf32>
    %30 = vector.broadcast %10 : vector<1x32xf32> to vector<10x32xf32>
    %31 = arith.mulf %29, %30 : vector<10x32xf32>
    %32 = vector.broadcast %11 : vector<1x32xf32> to vector<10x32xf32>
    %33 = arith.addf %31, %32 : vector<10x32xf32>
    %c144 = arith.constant 144 : index
    %c0_15 = arith.constant 0 : index
    %34 = vector.load %arg1[%c144, %c0_15] : memref<592x96xf32, #tpu.memory_space<vmem>>, vector<32x96xf32>
    %cst_16 = arith.constant dense<0.000000e+00> : vector<10x96xf32>
    %35 = tpu.matmul %33, %34, %cst_16 {dimension_numbers = #tpu.dot_dimension_numbers<[1], [0], [0], [1], [0, 0, 1, 1], [], []>} : vector<10x32xf32>, vector<32x96xf32>, vector<10x96xf32> -> vector<10x96xf32>
    %c176 = arith.constant 176 : index
    %c0_17 = arith.constant 0 : index
    %36 = vector.load %arg1[%c176, %c0_17] : memref<592x96xf32, #tpu.memory_space<vmem>>, vector<1x96xf32>
    %37 = vector.broadcast %36 : vector<1x96xf32> to vector<10x96xf32>
    %38 = arith.addf %35, %37 : vector<10x96xf32>
    %39 = vector.extract_strided_slice %38 {offsets = [0, 0], sizes = [10, 8], strides = [1, 1]} : vector<10x96xf32> to vector<10x8xf32>
    %40 = vector.extract_strided_slice %38 {offsets = [0, 32], sizes = [10, 8], strides = [1, 1]} : vector<10x96xf32> to vector<10x8xf32>
    %41 = vector.extract_strided_slice %38 {offsets = [0, 64], sizes = [10, 8], strides = [1, 1]} : vector<10x96xf32> to vector<10x8xf32>
    %cst_18 = arith.constant dense<0.000000e+00> : vector<10x10xf32>
    %42 = tpu.matmul %39, %40, %cst_18 {dimension_numbers = #tpu.dot_dimension_numbers<[1], [1], [0], [0], [0, 0, 1, 0], [], []>} : vector<10x8xf32>, vector<10x8xf32>, vector<10x10xf32> -> vector<10x10xf32>
    %cst_19 = arith.constant 0.353553385 : f32
    %43 = vector.broadcast %cst_19 : f32 to vector<10x10xf32>
    %44 = arith.mulf %42, %43 : vector<10x10xf32>
    %45 = arith.addf %44, %9 : vector<10x10xf32>
    %cst_20 = arith.constant dense<0xFF800000> : vector<10xf32>
    %46 = vector.multi_reduction <maximumf>, %45, %cst_20 [1] : vector<10x10xf32> to vector<10xf32>
    %47 = vector.shape_cast %46 : vector<10xf32> to vector<10x1xf32>
    %48 = vector.broadcast %47 : vector<10x1xf32> to vector<10x10xf32>
    %49 = arith.subf %45, %48 : vector<10x10xf32>
    %50 = math.exp %49 : vector<10x10xf32>
    %cst_21 = arith.constant dense<0.000000e+00> : vector<10xf32>
    %51 = vector.multi_reduction <add>, %50, %cst_21 [1] : vector<10x10xf32> to vector<10xf32>
    %52 = vector.shape_cast %51 : vector<10xf32> to vector<10x1xf32>
    %53 = tpu.reciprocal %52 {approx = true} : vector<10x1xf32> -> vector<10x1xf32>
    %54 = vector.broadcast %53 : vector<10x1xf32> to vector<10x10xf32>
    %55 = arith.mulf %50, %54 : vector<10x10xf32>
    %cst_22 = arith.constant dense<0.000000e+00> : vector<10x8xf32>
    %56 = tpu.matmul %55, %41, %cst_22 {dimension_numbers = #tpu.dot_dimension_numbers<[1], [0], [0], [1], [0, 0, 1, 1], [], []>} : vector<10x10xf32>, vector<10x8xf32>, vector<10x8xf32> -> vector<10x8xf32>
    %57 = vector.extract_strided_slice %38 {offsets = [0, 8], sizes = [10, 8], strides = [1, 1]} : vector<10x96xf32> to vector<10x8xf32>
    %58 = vector.extract_strided_slice %38 {offsets = [0, 40], sizes = [10, 8], strides = [1, 1]} : vector<10x96xf32> to vector<10x8xf32>
    %59 = vector.extract_strided_slice %38 {offsets = [0, 72], sizes = [10, 8], strides = [1, 1]} : vector<10x96xf32> to vector<10x8xf32>
    %cst_23 = arith.constant dense<0.000000e+00> : vector<10x10xf32>
    %60 = tpu.matmul %57, %58, %cst_23 {dimension_numbers = #tpu.dot_dimension_numbers<[1], [1], [0], [0], [0, 0, 1, 0], [], []>} : vector<10x8xf32>, vector<10x8xf32>, vector<10x10xf32> -> vector<10x10xf32>
    %cst_24 = arith.constant 0.353553385 : f32
    %61 = vector.broadcast %cst_24 : f32 to vector<10x10xf32>
    %62 = arith.mulf %60, %61 : vector<10x10xf32>
    %63 = arith.addf %62, %9 : vector<10x10xf32>
    %cst_25 = arith.constant dense<0xFF800000> : vector<10xf32>
    %64 = vector.multi_reduction <maximumf>, %63, %cst_25 [1] : vector<10x10xf32> to vector<10xf32>
    %65 = vector.shape_cast %64 : vector<10xf32> to vector<10x1xf32>
    %66 = vector.broadcast %65 : vector<10x1xf32> to vector<10x10xf32>
    %67 = arith.subf %63, %66 : vector<10x10xf32>
    %68 = math.exp %67 : vector<10x10xf32>
    %cst_26 = arith.constant dense<0.000000e+00> : vector<10xf32>
    %69 = vector.multi_reduction <add>, %68, %cst_26 [1] : vector<10x10xf32> to vector<10xf32>
    %70 = vector.shape_cast %69 : vector<10xf32> to vector<10x1xf32>
    %71 = tpu.reciprocal %70 {approx = true} : vector<10x1xf32> -> vector<10x1xf32>
    %72 = vector.broadcast %71 : vector<10x1xf32> to vector<10x10xf32>
    %73 = arith.mulf %68, %72 : vector<10x10xf32>
    %cst_27 = arith.constant dense<0.000000e+00> : vector<10x8xf32>
    %74 = tpu.matmul %73, %59, %cst_27 {dimension_numbers = #tpu.dot_dimension_numbers<[1], [0], [0], [1], [0, 0, 1, 1], [], []>} : vector<10x10xf32>, vector<10x8xf32>, vector<10x8xf32> -> vector<10x8xf32>
    %75 = vector.extract_strided_slice %38 {offsets = [0, 16], sizes = [10, 8], strides = [1, 1]} : vector<10x96xf32> to vector<10x8xf32>
    %76 = vector.extract_strided_slice %38 {offsets = [0, 48], sizes = [10, 8], strides = [1, 1]} : vector<10x96xf32> to vector<10x8xf32>
    %77 = vector.extract_strided_slice %38 {offsets = [0, 80], sizes = [10, 8], strides = [1, 1]} : vector<10x96xf32> to vector<10x8xf32>
    %cst_28 = arith.constant dense<0.000000e+00> : vector<10x10xf32>
    %78 = tpu.matmul %75, %76, %cst_28 {dimension_numbers = #tpu.dot_dimension_numbers<[1], [1], [0], [0], [0, 0, 1, 0], [], []>} : vector<10x8xf32>, vector<10x8xf32>, vector<10x10xf32> -> vector<10x10xf32>
    %cst_29 = arith.constant 0.353553385 : f32
    %79 = vector.broadcast %cst_29 : f32 to vector<10x10xf32>
    %80 = arith.mulf %78, %79 : vector<10x10xf32>
    %81 = arith.addf %80, %9 : vector<10x10xf32>
    %cst_30 = arith.constant dense<0xFF800000> : vector<10xf32>
    %82 = vector.multi_reduction <maximumf>, %81, %cst_30 [1] : vector<10x10xf32> to vector<10xf32>
    %83 = vector.shape_cast %82 : vector<10xf32> to vector<10x1xf32>
    %84 = vector.broadcast %83 : vector<10x1xf32> to vector<10x10xf32>
    %85 = arith.subf %81, %84 : vector<10x10xf32>
    %86 = math.exp %85 : vector<10x10xf32>
    %cst_31 = arith.constant dense<0.000000e+00> : vector<10xf32>
    %87 = vector.multi_reduction <add>, %86, %cst_31 [1] : vector<10x10xf32> to vector<10xf32>
    %88 = vector.shape_cast %87 : vector<10xf32> to vector<10x1xf32>
    %89 = tpu.reciprocal %88 {approx = true} : vector<10x1xf32> -> vector<10x1xf32>
    %90 = vector.broadcast %89 : vector<10x1xf32> to vector<10x10xf32>
    %91 = arith.mulf %86, %90 : vector<10x10xf32>
    %cst_32 = arith.constant dense<0.000000e+00> : vector<10x8xf32>
    %92 = tpu.matmul %91, %77, %cst_32 {dimension_numbers = #tpu.dot_dimension_numbers<[1], [0], [0], [1], [0, 0, 1, 1], [], []>} : vector<10x10xf32>, vector<10x8xf32>, vector<10x8xf32> -> vector<10x8xf32>
    %93 = vector.extract_strided_slice %38 {offsets = [0, 24], sizes = [10, 8], strides = [1, 1]} : vector<10x96xf32> to vector<10x8xf32>
    %94 = vector.extract_strided_slice %38 {offsets = [0, 56], sizes = [10, 8], strides = [1, 1]} : vector<10x96xf32> to vector<10x8xf32>
    %95 = vector.extract_strided_slice %38 {offsets = [0, 88], sizes = [10, 8], strides = [1, 1]} : vector<10x96xf32> to vector<10x8xf32>
    %cst_33 = arith.constant dense<0.000000e+00> : vector<10x10xf32>
    %96 = tpu.matmul %93, %94, %cst_33 {dimension_numbers = #tpu.dot_dimension_numbers<[1], [1], [0], [0], [0, 0, 1, 0], [], []>} : vector<10x8xf32>, vector<10x8xf32>, vector<10x10xf32> -> vector<10x10xf32>
    %cst_34 = arith.constant 0.353553385 : f32
    %97 = vector.broadcast %cst_34 : f32 to vector<10x10xf32>
    %98 = arith.mulf %96, %97 : vector<10x10xf32>
    %99 = arith.addf %98, %9 : vector<10x10xf32>
    %cst_35 = arith.constant dense<0xFF800000> : vector<10xf32>
    %100 = vector.multi_reduction <maximumf>, %99, %cst_35 [1] : vector<10x10xf32> to vector<10xf32>
    %101 = vector.shape_cast %100 : vector<10xf32> to vector<10x1xf32>
    %102 = vector.broadcast %101 : vector<10x1xf32> to vector<10x10xf32>
    %103 = arith.subf %99, %102 : vector<10x10xf32>
    %104 = math.exp %103 : vector<10x10xf32>
    %cst_36 = arith.constant dense<0.000000e+00> : vector<10xf32>
    %105 = vector.multi_reduction <add>, %104, %cst_36 [1] : vector<10x10xf32> to vector<10xf32>
    %106 = vector.shape_cast %105 : vector<10xf32> to vector<10x1xf32>
    %107 = tpu.reciprocal %106 {approx = true} : vector<10x1xf32> -> vector<10x1xf32>
    %108 = vector.broadcast %107 : vector<10x1xf32> to vector<10x10xf32>
    %109 = arith.mulf %104, %108 : vector<10x10xf32>
    %cst_37 = arith.constant dense<0.000000e+00> : vector<10x8xf32>
    %110 = tpu.matmul %109, %95, %cst_37 {dimension_numbers = #tpu.dot_dimension_numbers<[1], [0], [0], [1], [0, 0, 1, 1], [], []>} : vector<10x10xf32>, vector<10x8xf32>, vector<10x8xf32> -> vector<10x8xf32>
    %111 = tpu.concatenate %56, %74, %92, %110 in 1 : vector<10x8xf32>, vector<10x8xf32>, vector<10x8xf32>, vector<10x8xf32> -> vector<10x32xf32>
    %c184 = arith.constant 184 : index
    %c0_38 = arith.constant 0 : index
    %112 = vector.load %arg1[%c184, %c0_38] : memref<592x96xf32, #tpu.memory_space<vmem>>, vector<32x32xf32>
    %cst_39 = arith.constant dense<0.000000e+00> : vector<10x32xf32>
    %113 = tpu.matmul %111, %112, %cst_39 {dimension_numbers = #tpu.dot_dimension_numbers<[1], [0], [0], [1], [0, 0, 1, 1], [], []>} : vector<10x32xf32>, vector<32x32xf32>, vector<10x32xf32> -> vector<10x32xf32>
    %114 = arith.addf %8, %113 : vector<10x32xf32>
    %c216 = arith.constant 216 : index
    %c0_40 = arith.constant 0 : index
    %115 = vector.load %arg1[%c216, %c0_40] : memref<592x96xf32, #tpu.memory_space<vmem>>, vector<1x32xf32>
    %116 = vector.broadcast %115 : vector<1x32xf32> to vector<10x32xf32>
    %117 = arith.addf %114, %116 : vector<10x32xf32>
    %c224 = arith.constant 224 : index
    %c0_41 = arith.constant 0 : index
    %118 = vector.load %arg1[%c224, %c0_41] : memref<592x96xf32, #tpu.memory_space<vmem>>, vector<1x32xf32>
    %c232 = arith.constant 232 : index
    %c0_42 = arith.constant 0 : index
    %119 = vector.load %arg1[%c232, %c0_42] : memref<592x96xf32, #tpu.memory_space<vmem>>, vector<1x32xf32>
    %cst_43 = arith.constant dense<0.000000e+00> : vector<10xf32>
    %120 = vector.multi_reduction <add>, %117, %cst_43 [1] : vector<10x32xf32> to vector<10xf32>
    %121 = vector.shape_cast %120 : vector<10xf32> to vector<10x1xf32>
    %cst_44 = arith.constant 3.200000e+01 : f32
    %122 = vector.broadcast %cst_44 : f32 to vector<10x1xf32>
    %123 = arith.divf %121, %122 : vector<10x1xf32>
    %124 = vector.broadcast %123 : vector<10x1xf32> to vector<10x32xf32>
    %125 = arith.subf %117, %124 : vector<10x32xf32>
    %126 = arith.mulf %125, %125 : vector<10x32xf32>
    %cst_45 = arith.constant dense<0.000000e+00> : vector<10xf32>
    %127 = vector.multi_reduction <add>, %126, %cst_45 [1] : vector<10x32xf32> to vector<10xf32>
    %128 = vector.shape_cast %127 : vector<10xf32> to vector<10x1xf32>
    %cst_46 = arith.constant 3.200000e+01 : f32
    %129 = vector.broadcast %cst_46 : f32 to vector<10x1xf32>
    %130 = arith.divf %128, %129 : vector<10x1xf32>
    %131 = vector.broadcast %123 : vector<10x1xf32> to vector<10x32xf32>
    %132 = arith.subf %117, %131 : vector<10x32xf32>
    %cst_47 = arith.constant 9.99999996E-13 : f32
    %133 = vector.broadcast %cst_47 : f32 to vector<10x1xf32>
    %134 = arith.addf %130, %133 : vector<10x1xf32>
    %135 = math.rsqrt %134 : vector<10x1xf32>
    %136 = vector.broadcast %135 : vector<10x1xf32> to vector<10x32xf32>
    %137 = arith.mulf %132, %136 : vector<10x32xf32>
    %138 = vector.broadcast %118 : vector<1x32xf32> to vector<10x32xf32>
    %139 = arith.mulf %137, %138 : vector<10x32xf32>
    %140 = vector.broadcast %119 : vector<1x32xf32> to vector<10x32xf32>
    %141 = arith.addf %139, %140 : vector<10x32xf32>
    %c240 = arith.constant 240 : index
    %c0_48 = arith.constant 0 : index
    %142 = vector.load %arg1[%c240, %c0_48] : memref<592x96xf32, #tpu.memory_space<vmem>>, vector<32x64xf32>
    %cst_49 = arith.constant dense<0.000000e+00> : vector<10x64xf32>
    %143 = tpu.matmul %141, %142, %cst_49 {dimension_numbers = #tpu.dot_dimension_numbers<[1], [0], [0], [1], [0, 0, 1, 1], [], []>} : vector<10x32xf32>, vector<32x64xf32>, vector<10x64xf32> -> vector<10x64xf32>
    %c272 = arith.constant 272 : index
    %c0_50 = arith.constant 0 : index
    %144 = vector.load %arg1[%c272, %c0_50] : memref<592x96xf32, #tpu.memory_space<vmem>>, vector<1x64xf32>
    %145 = vector.broadcast %144 : vector<1x64xf32> to vector<10x64xf32>
    %146 = arith.addf %143, %145 : vector<10x64xf32>
    %cst_51 = arith.constant 5.000000e-01 : f32
    %147 = vector.broadcast %cst_51 : f32 to vector<10x64xf32>
    %148 = arith.mulf %147, %146 : vector<10x64xf32>
    %cst_52 = arith.constant 0.707106769 : f32
    %149 = vector.broadcast %cst_52 : f32 to vector<10x64xf32>
    %150 = arith.mulf %146, %149 : vector<10x64xf32>
    %cst_53 = arith.constant 0.000000e+00 : f32
    %151 = vector.broadcast %cst_53 : f32 to vector<10x64xf32>
    %152 = arith.cmpf oge, %150, %151 : vector<10x64xf32>
    %cst_54 = arith.constant 1.000000e+00 : f32
    %cst_55 = arith.constant -1.000000e+00 : f32
    %153 = vector.broadcast %cst_54 : f32 to vector<10x64xf32>
    %154 = vector.broadcast %cst_55 : f32 to vector<10x64xf32>
    %155 = arith.select %152, %153, %154 : vector<10x64xi1>, vector<10x64xf32>
    %156 = math.absf %150 : vector<10x64xf32>
    %cst_56 = arith.constant 0.327591091 : f32
    %157 = vector.broadcast %cst_56 : f32 to vector<10x64xf32>
    %158 = arith.mulf %157, %156 : vector<10x64xf32>
    %cst_57 = arith.constant 1.000000e+00 : f32
    %159 = vector.broadcast %cst_57 : f32 to vector<10x64xf32>
    %160 = arith.addf %159, %158 : vector<10x64xf32>
    %cst_58 = arith.constant 1.000000e+00 : f32
    %161 = vector.broadcast %cst_58 : f32 to vector<10x64xf32>
    %162 = arith.divf %161, %160 : vector<10x64xf32>
    %cst_59 = arith.constant 1.06140542 : f32
    %163 = vector.broadcast %cst_59 : f32 to vector<10x64xf32>
    %164 = arith.mulf %163, %162 : vector<10x64xf32>
    %cst_60 = arith.constant -1.45315206 : f32
    %165 = vector.broadcast %cst_60 : f32 to vector<10x64xf32>
    %166 = arith.addf %164, %165 : vector<10x64xf32>
    %167 = arith.mulf %166, %162 : vector<10x64xf32>
    %cst_61 = arith.constant 1.42141378 : f32
    %168 = vector.broadcast %cst_61 : f32 to vector<10x64xf32>
    %169 = arith.addf %167, %168 : vector<10x64xf32>
    %170 = arith.mulf %169, %162 : vector<10x64xf32>
    %cst_62 = arith.constant -0.284496725 : f32
    %171 = vector.broadcast %cst_62 : f32 to vector<10x64xf32>
    %172 = arith.addf %170, %171 : vector<10x64xf32>
    %173 = arith.mulf %172, %162 : vector<10x64xf32>
    %cst_63 = arith.constant 0.254829586 : f32
    %174 = vector.broadcast %cst_63 : f32 to vector<10x64xf32>
    %175 = arith.addf %173, %174 : vector<10x64xf32>
    %176 = arith.mulf %175, %162 : vector<10x64xf32>
    %cst_64 = arith.constant 0.000000e+00 : f32
    %177 = vector.broadcast %cst_64 : f32 to vector<10x64xf32>
    %178 = arith.subf %177, %156 : vector<10x64xf32>
    %179 = arith.mulf %178, %156 : vector<10x64xf32>
    %180 = math.exp %179 : vector<10x64xf32>
    %181 = arith.mulf %176, %180 : vector<10x64xf32>
    %cst_65 = arith.constant 1.000000e+00 : f32
    %182 = vector.broadcast %cst_65 : f32 to vector<10x64xf32>
    %183 = arith.subf %182, %181 : vector<10x64xf32>
    %184 = arith.mulf %155, %183 : vector<10x64xf32>
    %cst_66 = arith.constant 1.000000e+00 : f32
    %185 = vector.broadcast %cst_66 : f32 to vector<10x64xf32>
    %186 = arith.addf %185, %184 : vector<10x64xf32>
    %187 = arith.mulf %148, %186 : vector<10x64xf32>
    %c280 = arith.constant 280 : index
    %c0_67 = arith.constant 0 : index
    %188 = vector.load %arg1[%c280, %c0_67] : memref<592x96xf32, #tpu.memory_space<vmem>>, vector<64x32xf32>
    %cst_68 = arith.constant dense<0.000000e+00> : vector<10x32xf32>
    %189 = tpu.matmul %187, %188, %cst_68 {dimension_numbers = #tpu.dot_dimension_numbers<[1], [0], [0], [1], [0, 0, 1, 1], [], []>} : vector<10x64xf32>, vector<64x32xf32>, vector<10x32xf32> -> vector<10x32xf32>
    %190 = arith.addf %117, %189 : vector<10x32xf32>
    %c344 = arith.constant 344 : index
    %c0_69 = arith.constant 0 : index
    %191 = vector.load %arg1[%c344, %c0_69] : memref<592x96xf32, #tpu.memory_space<vmem>>, vector<1x32xf32>
    %192 = vector.broadcast %191 : vector<1x32xf32> to vector<10x32xf32>
    %193 = arith.addf %190, %192 : vector<10x32xf32>
    %c352 = arith.constant 352 : index
    %c0_70 = arith.constant 0 : index
    %194 = vector.load %arg1[%c352, %c0_70] : memref<592x96xf32, #tpu.memory_space<vmem>>, vector<1x32xf32>
    %c360 = arith.constant 360 : index
    %c0_71 = arith.constant 0 : index
    %195 = vector.load %arg1[%c360, %c0_71] : memref<592x96xf32, #tpu.memory_space<vmem>>, vector<1x32xf32>
    %cst_72 = arith.constant dense<0.000000e+00> : vector<10xf32>
    %196 = vector.multi_reduction <add>, %193, %cst_72 [1] : vector<10x32xf32> to vector<10xf32>
    %197 = vector.shape_cast %196 : vector<10xf32> to vector<10x1xf32>
    %cst_73 = arith.constant 3.200000e+01 : f32
    %198 = vector.broadcast %cst_73 : f32 to vector<10x1xf32>
    %199 = arith.divf %197, %198 : vector<10x1xf32>
    %200 = vector.broadcast %199 : vector<10x1xf32> to vector<10x32xf32>
    %201 = arith.subf %193, %200 : vector<10x32xf32>
    %202 = arith.mulf %201, %201 : vector<10x32xf32>
    %cst_74 = arith.constant dense<0.000000e+00> : vector<10xf32>
    %203 = vector.multi_reduction <add>, %202, %cst_74 [1] : vector<10x32xf32> to vector<10xf32>
    %204 = vector.shape_cast %203 : vector<10xf32> to vector<10x1xf32>
    %cst_75 = arith.constant 3.200000e+01 : f32
    %205 = vector.broadcast %cst_75 : f32 to vector<10x1xf32>
    %206 = arith.divf %204, %205 : vector<10x1xf32>
    %207 = vector.broadcast %199 : vector<10x1xf32> to vector<10x32xf32>
    %208 = arith.subf %193, %207 : vector<10x32xf32>
    %cst_76 = arith.constant 9.99999996E-13 : f32
    %209 = vector.broadcast %cst_76 : f32 to vector<10x1xf32>
    %210 = arith.addf %206, %209 : vector<10x1xf32>
    %211 = math.rsqrt %210 : vector<10x1xf32>
    %212 = vector.broadcast %211 : vector<10x1xf32> to vector<10x32xf32>
    %213 = arith.mulf %208, %212 : vector<10x32xf32>
    %214 = vector.broadcast %194 : vector<1x32xf32> to vector<10x32xf32>
    %215 = arith.mulf %213, %214 : vector<10x32xf32>
    %216 = vector.broadcast %195 : vector<1x32xf32> to vector<10x32xf32>
    %217 = arith.addf %215, %216 : vector<10x32xf32>
    %c368 = arith.constant 368 : index
    %c0_77 = arith.constant 0 : index
    %218 = vector.load %arg1[%c368, %c0_77] : memref<592x96xf32, #tpu.memory_space<vmem>>, vector<32x96xf32>
    %cst_78 = arith.constant dense<0.000000e+00> : vector<10x96xf32>
    %219 = tpu.matmul %217, %218, %cst_78 {dimension_numbers = #tpu.dot_dimension_numbers<[1], [0], [0], [1], [0, 0, 1, 1], [], []>} : vector<10x32xf32>, vector<32x96xf32>, vector<10x96xf32> -> vector<10x96xf32>
    %c400 = arith.constant 400 : index
    %c0_79 = arith.constant 0 : index
    %220 = vector.load %arg1[%c400, %c0_79] : memref<592x96xf32, #tpu.memory_space<vmem>>, vector<1x96xf32>
    %221 = vector.broadcast %220 : vector<1x96xf32> to vector<10x96xf32>
    %222 = arith.addf %219, %221 : vector<10x96xf32>
    %223 = vector.extract_strided_slice %222 {offsets = [0, 0], sizes = [10, 8], strides = [1, 1]} : vector<10x96xf32> to vector<10x8xf32>
    %224 = vector.extract_strided_slice %222 {offsets = [0, 32], sizes = [10, 8], strides = [1, 1]} : vector<10x96xf32> to vector<10x8xf32>
    %225 = vector.extract_strided_slice %222 {offsets = [0, 64], sizes = [10, 8], strides = [1, 1]} : vector<10x96xf32> to vector<10x8xf32>
    %cst_80 = arith.constant dense<0.000000e+00> : vector<10x10xf32>
    %226 = tpu.matmul %223, %224, %cst_80 {dimension_numbers = #tpu.dot_dimension_numbers<[1], [1], [0], [0], [0, 0, 1, 0], [], []>} : vector<10x8xf32>, vector<10x8xf32>, vector<10x10xf32> -> vector<10x10xf32>
    %cst_81 = arith.constant 0.353553385 : f32
    %227 = vector.broadcast %cst_81 : f32 to vector<10x10xf32>
    %228 = arith.mulf %226, %227 : vector<10x10xf32>
    %229 = arith.addf %228, %9 : vector<10x10xf32>
    %cst_82 = arith.constant dense<0xFF800000> : vector<10xf32>
    %230 = vector.multi_reduction <maximumf>, %229, %cst_82 [1] : vector<10x10xf32> to vector<10xf32>
    %231 = vector.shape_cast %230 : vector<10xf32> to vector<10x1xf32>
    %232 = vector.broadcast %231 : vector<10x1xf32> to vector<10x10xf32>
    %233 = arith.subf %229, %232 : vector<10x10xf32>
    %234 = math.exp %233 : vector<10x10xf32>
    %cst_83 = arith.constant dense<0.000000e+00> : vector<10xf32>
    %235 = vector.multi_reduction <add>, %234, %cst_83 [1] : vector<10x10xf32> to vector<10xf32>
    %236 = vector.shape_cast %235 : vector<10xf32> to vector<10x1xf32>
    %237 = tpu.reciprocal %236 {approx = true} : vector<10x1xf32> -> vector<10x1xf32>
    %238 = vector.broadcast %237 : vector<10x1xf32> to vector<10x10xf32>
    %239 = arith.mulf %234, %238 : vector<10x10xf32>
    %cst_84 = arith.constant dense<0.000000e+00> : vector<10x8xf32>
    %240 = tpu.matmul %239, %225, %cst_84 {dimension_numbers = #tpu.dot_dimension_numbers<[1], [0], [0], [1], [0, 0, 1, 1], [], []>} : vector<10x10xf32>, vector<10x8xf32>, vector<10x8xf32> -> vector<10x8xf32>
    %241 = vector.extract_strided_slice %222 {offsets = [0, 8], sizes = [10, 8], strides = [1, 1]} : vector<10x96xf32> to vector<10x8xf32>
    %242 = vector.extract_strided_slice %222 {offsets = [0, 40], sizes = [10, 8], strides = [1, 1]} : vector<10x96xf32> to vector<10x8xf32>
    %243 = vector.extract_strided_slice %222 {offsets = [0, 72], sizes = [10, 8], strides = [1, 1]} : vector<10x96xf32> to vector<10x8xf32>
    %cst_85 = arith.constant dense<0.000000e+00> : vector<10x10xf32>
    %244 = tpu.matmul %241, %242, %cst_85 {dimension_numbers = #tpu.dot_dimension_numbers<[1], [1], [0], [0], [0, 0, 1, 0], [], []>} : vector<10x8xf32>, vector<10x8xf32>, vector<10x10xf32> -> vector<10x10xf32>
    %cst_86 = arith.constant 0.353553385 : f32
    %245 = vector.broadcast %cst_86 : f32 to vector<10x10xf32>
    %246 = arith.mulf %244, %245 : vector<10x10xf32>
    %247 = arith.addf %246, %9 : vector<10x10xf32>
    %cst_87 = arith.constant dense<0xFF800000> : vector<10xf32>
    %248 = vector.multi_reduction <maximumf>, %247, %cst_87 [1] : vector<10x10xf32> to vector<10xf32>
    %249 = vector.shape_cast %248 : vector<10xf32> to vector<10x1xf32>
    %250 = vector.broadcast %249 : vector<10x1xf32> to vector<10x10xf32>
    %251 = arith.subf %247, %250 : vector<10x10xf32>
    %252 = math.exp %251 : vector<10x10xf32>
    %cst_88 = arith.constant dense<0.000000e+00> : vector<10xf32>
    %253 = vector.multi_reduction <add>, %252, %cst_88 [1] : vector<10x10xf32> to vector<10xf32>
    %254 = vector.shape_cast %253 : vector<10xf32> to vector<10x1xf32>
    %255 = tpu.reciprocal %254 {approx = true} : vector<10x1xf32> -> vector<10x1xf32>
    %256 = vector.broadcast %255 : vector<10x1xf32> to vector<10x10xf32>
    %257 = arith.mulf %252, %256 : vector<10x10xf32>
    %cst_89 = arith.constant dense<0.000000e+00> : vector<10x8xf32>
    %258 = tpu.matmul %257, %243, %cst_89 {dimension_numbers = #tpu.dot_dimension_numbers<[1], [0], [0], [1], [0, 0, 1, 1], [], []>} : vector<10x10xf32>, vector<10x8xf32>, vector<10x8xf32> -> vector<10x8xf32>
    %259 = vector.extract_strided_slice %222 {offsets = [0, 16], sizes = [10, 8], strides = [1, 1]} : vector<10x96xf32> to vector<10x8xf32>
    %260 = vector.extract_strided_slice %222 {offsets = [0, 48], sizes = [10, 8], strides = [1, 1]} : vector<10x96xf32> to vector<10x8xf32>
    %261 = vector.extract_strided_slice %222 {offsets = [0, 80], sizes = [10, 8], strides = [1, 1]} : vector<10x96xf32> to vector<10x8xf32>
    %cst_90 = arith.constant dense<0.000000e+00> : vector<10x10xf32>
    %262 = tpu.matmul %259, %260, %cst_90 {dimension_numbers = #tpu.dot_dimension_numbers<[1], [1], [0], [0], [0, 0, 1, 0], [], []>} : vector<10x8xf32>, vector<10x8xf32>, vector<10x10xf32> -> vector<10x10xf32>
    %cst_91 = arith.constant 0.353553385 : f32
    %263 = vector.broadcast %cst_91 : f32 to vector<10x10xf32>
    %264 = arith.mulf %262, %263 : vector<10x10xf32>
    %265 = arith.addf %264, %9 : vector<10x10xf32>
    %cst_92 = arith.constant dense<0xFF800000> : vector<10xf32>
    %266 = vector.multi_reduction <maximumf>, %265, %cst_92 [1] : vector<10x10xf32> to vector<10xf32>
    %267 = vector.shape_cast %266 : vector<10xf32> to vector<10x1xf32>
    %268 = vector.broadcast %267 : vector<10x1xf32> to vector<10x10xf32>
    %269 = arith.subf %265, %268 : vector<10x10xf32>
    %270 = math.exp %269 : vector<10x10xf32>
    %cst_93 = arith.constant dense<0.000000e+00> : vector<10xf32>
    %271 = vector.multi_reduction <add>, %270, %cst_93 [1] : vector<10x10xf32> to vector<10xf32>
    %272 = vector.shape_cast %271 : vector<10xf32> to vector<10x1xf32>
    %273 = tpu.reciprocal %272 {approx = true} : vector<10x1xf32> -> vector<10x1xf32>
    %274 = vector.broadcast %273 : vector<10x1xf32> to vector<10x10xf32>
    %275 = arith.mulf %270, %274 : vector<10x10xf32>
    %cst_94 = arith.constant dense<0.000000e+00> : vector<10x8xf32>
    %276 = tpu.matmul %275, %261, %cst_94 {dimension_numbers = #tpu.dot_dimension_numbers<[1], [0], [0], [1], [0, 0, 1, 1], [], []>} : vector<10x10xf32>, vector<10x8xf32>, vector<10x8xf32> -> vector<10x8xf32>
    %277 = vector.extract_strided_slice %222 {offsets = [0, 24], sizes = [10, 8], strides = [1, 1]} : vector<10x96xf32> to vector<10x8xf32>
    %278 = vector.extract_strided_slice %222 {offsets = [0, 56], sizes = [10, 8], strides = [1, 1]} : vector<10x96xf32> to vector<10x8xf32>
    %279 = vector.extract_strided_slice %222 {offsets = [0, 88], sizes = [10, 8], strides = [1, 1]} : vector<10x96xf32> to vector<10x8xf32>
    %cst_95 = arith.constant dense<0.000000e+00> : vector<10x10xf32>
    %280 = tpu.matmul %277, %278, %cst_95 {dimension_numbers = #tpu.dot_dimension_numbers<[1], [1], [0], [0], [0, 0, 1, 0], [], []>} : vector<10x8xf32>, vector<10x8xf32>, vector<10x10xf32> -> vector<10x10xf32>
    %cst_96 = arith.constant 0.353553385 : f32
    %281 = vector.broadcast %cst_96 : f32 to vector<10x10xf32>
    %282 = arith.mulf %280, %281 : vector<10x10xf32>
    %283 = arith.addf %282, %9 : vector<10x10xf32>
    %cst_97 = arith.constant dense<0xFF800000> : vector<10xf32>
    %284 = vector.multi_reduction <maximumf>, %283, %cst_97 [1] : vector<10x10xf32> to vector<10xf32>
    %285 = vector.shape_cast %284 : vector<10xf32> to vector<10x1xf32>
    %286 = vector.broadcast %285 : vector<10x1xf32> to vector<10x10xf32>
    %287 = arith.subf %283, %286 : vector<10x10xf32>
    %288 = math.exp %287 : vector<10x10xf32>
    %cst_98 = arith.constant dense<0.000000e+00> : vector<10xf32>
    %289 = vector.multi_reduction <add>, %288, %cst_98 [1] : vector<10x10xf32> to vector<10xf32>
    %290 = vector.shape_cast %289 : vector<10xf32> to vector<10x1xf32>
    %291 = tpu.reciprocal %290 {approx = true} : vector<10x1xf32> -> vector<10x1xf32>
    %292 = vector.broadcast %291 : vector<10x1xf32> to vector<10x10xf32>
    %293 = arith.mulf %288, %292 : vector<10x10xf32>
    %cst_99 = arith.constant dense<0.000000e+00> : vector<10x8xf32>
    %294 = tpu.matmul %293, %279, %cst_99 {dimension_numbers = #tpu.dot_dimension_numbers<[1], [0], [0], [1], [0, 0, 1, 1], [], []>} : vector<10x10xf32>, vector<10x8xf32>, vector<10x8xf32> -> vector<10x8xf32>
    %295 = tpu.concatenate %240, %258, %276, %294 in 1 : vector<10x8xf32>, vector<10x8xf32>, vector<10x8xf32>, vector<10x8xf32> -> vector<10x32xf32>
    %c408 = arith.constant 408 : index
    %c0_100 = arith.constant 0 : index
    %296 = vector.load %arg1[%c408, %c0_100] : memref<592x96xf32, #tpu.memory_space<vmem>>, vector<32x32xf32>
    %cst_101 = arith.constant dense<0.000000e+00> : vector<10x32xf32>
    %297 = tpu.matmul %295, %296, %cst_101 {dimension_numbers = #tpu.dot_dimension_numbers<[1], [0], [0], [1], [0, 0, 1, 1], [], []>} : vector<10x32xf32>, vector<32x32xf32>, vector<10x32xf32> -> vector<10x32xf32>
    %298 = arith.addf %193, %297 : vector<10x32xf32>
    %c440 = arith.constant 440 : index
    %c0_102 = arith.constant 0 : index
    %299 = vector.load %arg1[%c440, %c0_102] : memref<592x96xf32, #tpu.memory_space<vmem>>, vector<1x32xf32>
    %300 = vector.broadcast %299 : vector<1x32xf32> to vector<10x32xf32>
    %301 = arith.addf %298, %300 : vector<10x32xf32>
    %c448 = arith.constant 448 : index
    %c0_103 = arith.constant 0 : index
    %302 = vector.load %arg1[%c448, %c0_103] : memref<592x96xf32, #tpu.memory_space<vmem>>, vector<1x32xf32>
    %c456 = arith.constant 456 : index
    %c0_104 = arith.constant 0 : index
    %303 = vector.load %arg1[%c456, %c0_104] : memref<592x96xf32, #tpu.memory_space<vmem>>, vector<1x32xf32>
    %cst_105 = arith.constant dense<0.000000e+00> : vector<10xf32>
    %304 = vector.multi_reduction <add>, %301, %cst_105 [1] : vector<10x32xf32> to vector<10xf32>
    %305 = vector.shape_cast %304 : vector<10xf32> to vector<10x1xf32>
    %cst_106 = arith.constant 3.200000e+01 : f32
    %306 = vector.broadcast %cst_106 : f32 to vector<10x1xf32>
    %307 = arith.divf %305, %306 : vector<10x1xf32>
    %308 = vector.broadcast %307 : vector<10x1xf32> to vector<10x32xf32>
    %309 = arith.subf %301, %308 : vector<10x32xf32>
    %310 = arith.mulf %309, %309 : vector<10x32xf32>
    %cst_107 = arith.constant dense<0.000000e+00> : vector<10xf32>
    %311 = vector.multi_reduction <add>, %310, %cst_107 [1] : vector<10x32xf32> to vector<10xf32>
    %312 = vector.shape_cast %311 : vector<10xf32> to vector<10x1xf32>
    %cst_108 = arith.constant 3.200000e+01 : f32
    %313 = vector.broadcast %cst_108 : f32 to vector<10x1xf32>
    %314 = arith.divf %312, %313 : vector<10x1xf32>
    %315 = vector.broadcast %307 : vector<10x1xf32> to vector<10x32xf32>
    %316 = arith.subf %301, %315 : vector<10x32xf32>
    %cst_109 = arith.constant 9.99999996E-13 : f32
    %317 = vector.broadcast %cst_109 : f32 to vector<10x1xf32>
    %318 = arith.addf %314, %317 : vector<10x1xf32>
    %319 = math.rsqrt %318 : vector<10x1xf32>
    %320 = vector.broadcast %319 : vector<10x1xf32> to vector<10x32xf32>
    %321 = arith.mulf %316, %320 : vector<10x32xf32>
    %322 = vector.broadcast %302 : vector<1x32xf32> to vector<10x32xf32>
    %323 = arith.mulf %321, %322 : vector<10x32xf32>
    %324 = vector.broadcast %303 : vector<1x32xf32> to vector<10x32xf32>
    %325 = arith.addf %323, %324 : vector<10x32xf32>
    %c464 = arith.constant 464 : index
    %c0_110 = arith.constant 0 : index
    %326 = vector.load %arg1[%c464, %c0_110] : memref<592x96xf32, #tpu.memory_space<vmem>>, vector<32x64xf32>
    %cst_111 = arith.constant dense<0.000000e+00> : vector<10x64xf32>
    %327 = tpu.matmul %325, %326, %cst_111 {dimension_numbers = #tpu.dot_dimension_numbers<[1], [0], [0], [1], [0, 0, 1, 1], [], []>} : vector<10x32xf32>, vector<32x64xf32>, vector<10x64xf32> -> vector<10x64xf32>
    %c496 = arith.constant 496 : index
    %c0_112 = arith.constant 0 : index
    %328 = vector.load %arg1[%c496, %c0_112] : memref<592x96xf32, #tpu.memory_space<vmem>>, vector<1x64xf32>
    %329 = vector.broadcast %328 : vector<1x64xf32> to vector<10x64xf32>
    %330 = arith.addf %327, %329 : vector<10x64xf32>
    %cst_113 = arith.constant 5.000000e-01 : f32
    %331 = vector.broadcast %cst_113 : f32 to vector<10x64xf32>
    %332 = arith.mulf %331, %330 : vector<10x64xf32>
    %cst_114 = arith.constant 0.707106769 : f32
    %333 = vector.broadcast %cst_114 : f32 to vector<10x64xf32>
    %334 = arith.mulf %330, %333 : vector<10x64xf32>
    %cst_115 = arith.constant 0.000000e+00 : f32
    %335 = vector.broadcast %cst_115 : f32 to vector<10x64xf32>
    %336 = arith.cmpf oge, %334, %335 : vector<10x64xf32>
    %cst_116 = arith.constant 1.000000e+00 : f32
    %cst_117 = arith.constant -1.000000e+00 : f32
    %337 = vector.broadcast %cst_116 : f32 to vector<10x64xf32>
    %338 = vector.broadcast %cst_117 : f32 to vector<10x64xf32>
    %339 = arith.select %336, %337, %338 : vector<10x64xi1>, vector<10x64xf32>
    %340 = math.absf %334 : vector<10x64xf32>
    %cst_118 = arith.constant 0.327591091 : f32
    %341 = vector.broadcast %cst_118 : f32 to vector<10x64xf32>
    %342 = arith.mulf %341, %340 : vector<10x64xf32>
    %cst_119 = arith.constant 1.000000e+00 : f32
    %343 = vector.broadcast %cst_119 : f32 to vector<10x64xf32>
    %344 = arith.addf %343, %342 : vector<10x64xf32>
    %cst_120 = arith.constant 1.000000e+00 : f32
    %345 = vector.broadcast %cst_120 : f32 to vector<10x64xf32>
    %346 = arith.divf %345, %344 : vector<10x64xf32>
    %cst_121 = arith.constant 1.06140542 : f32
    %347 = vector.broadcast %cst_121 : f32 to vector<10x64xf32>
    %348 = arith.mulf %347, %346 : vector<10x64xf32>
    %cst_122 = arith.constant -1.45315206 : f32
    %349 = vector.broadcast %cst_122 : f32 to vector<10x64xf32>
    %350 = arith.addf %348, %349 : vector<10x64xf32>
    %351 = arith.mulf %350, %346 : vector<10x64xf32>
    %cst_123 = arith.constant 1.42141378 : f32
    %352 = vector.broadcast %cst_123 : f32 to vector<10x64xf32>
    %353 = arith.addf %351, %352 : vector<10x64xf32>
    %354 = arith.mulf %353, %346 : vector<10x64xf32>
    %cst_124 = arith.constant -0.284496725 : f32
    %355 = vector.broadcast %cst_124 : f32 to vector<10x64xf32>
    %356 = arith.addf %354, %355 : vector<10x64xf32>
    %357 = arith.mulf %356, %346 : vector<10x64xf32>
    %cst_125 = arith.constant 0.254829586 : f32
    %358 = vector.broadcast %cst_125 : f32 to vector<10x64xf32>
    %359 = arith.addf %357, %358 : vector<10x64xf32>
    %360 = arith.mulf %359, %346 : vector<10x64xf32>
    %cst_126 = arith.constant 0.000000e+00 : f32
    %361 = vector.broadcast %cst_126 : f32 to vector<10x64xf32>
    %362 = arith.subf %361, %340 : vector<10x64xf32>
    %363 = arith.mulf %362, %340 : vector<10x64xf32>
    %364 = math.exp %363 : vector<10x64xf32>
    %365 = arith.mulf %360, %364 : vector<10x64xf32>
    %cst_127 = arith.constant 1.000000e+00 : f32
    %366 = vector.broadcast %cst_127 : f32 to vector<10x64xf32>
    %367 = arith.subf %366, %365 : vector<10x64xf32>
    %368 = arith.mulf %339, %367 : vector<10x64xf32>
    %cst_128 = arith.constant 1.000000e+00 : f32
    %369 = vector.broadcast %cst_128 : f32 to vector<10x64xf32>
    %370 = arith.addf %369, %368 : vector<10x64xf32>
    %371 = arith.mulf %332, %370 : vector<10x64xf32>
    %c504 = arith.constant 504 : index
    %c0_129 = arith.constant 0 : index
    %372 = vector.load %arg1[%c504, %c0_129] : memref<592x96xf32, #tpu.memory_space<vmem>>, vector<64x32xf32>
    %cst_130 = arith.constant dense<0.000000e+00> : vector<10x32xf32>
    %373 = tpu.matmul %371, %372, %cst_130 {dimension_numbers = #tpu.dot_dimension_numbers<[1], [0], [0], [1], [0, 0, 1, 1], [], []>} : vector<10x64xf32>, vector<64x32xf32>, vector<10x32xf32> -> vector<10x32xf32>
    %374 = arith.addf %301, %373 : vector<10x32xf32>
    %c568 = arith.constant 568 : index
    %c0_131 = arith.constant 0 : index
    %375 = vector.load %arg1[%c568, %c0_131] : memref<592x96xf32, #tpu.memory_space<vmem>>, vector<1x32xf32>
    %376 = vector.broadcast %375 : vector<1x32xf32> to vector<10x32xf32>
    %377 = arith.addf %374, %376 : vector<10x32xf32>
    %378 = vector.extract_strided_slice %377 {offsets = [0, 0], sizes = [1, 32], strides = [1, 1]} : vector<10x32xf32> to vector<1x32xf32>
    %379 = vector.extract_strided_slice %377 {offsets = [5, 0], sizes = [1, 32], strides = [1, 1]} : vector<10x32xf32> to vector<1x32xf32>
    %380 = tpu.concatenate %378, %379 in 0 : vector<1x32xf32>, vector<1x32xf32> -> vector<2x32xf32>
    %c576 = arith.constant 576 : index
    %c0_132 = arith.constant 0 : index
    %381 = vector.load %arg1[%c576, %c0_132] : memref<592x96xf32, #tpu.memory_space<vmem>>, vector<1x32xf32>
    %c584 = arith.constant 584 : index
    %c0_133 = arith.constant 0 : index
    %382 = vector.load %arg1[%c584, %c0_133] : memref<592x96xf32, #tpu.memory_space<vmem>>, vector<1x32xf32>
    %cst_134 = arith.constant dense<0.000000e+00> : vector<2xf32>
    %383 = vector.multi_reduction <add>, %380, %cst_134 [1] : vector<2x32xf32> to vector<2xf32>
    %384 = vector.shape_cast %383 : vector<2xf32> to vector<2x1xf32>
    %cst_135 = arith.constant 3.200000e+01 : f32
    %385 = vector.broadcast %cst_135 : f32 to vector<2x1xf32>
    %386 = arith.divf %384, %385 : vector<2x1xf32>
    %387 = vector.broadcast %386 : vector<2x1xf32> to vector<2x32xf32>
    %388 = arith.subf %380, %387 : vector<2x32xf32>
    %389 = arith.mulf %388, %388 : vector<2x32xf32>
    %cst_136 = arith.constant dense<0.000000e+00> : vector<2xf32>
    %390 = vector.multi_reduction <add>, %389, %cst_136 [1] : vector<2x32xf32> to vector<2xf32>
    %391 = vector.shape_cast %390 : vector<2xf32> to vector<2x1xf32>
    %cst_137 = arith.constant 3.200000e+01 : f32
    %392 = vector.broadcast %cst_137 : f32 to vector<2x1xf32>
    %393 = arith.divf %391, %392 : vector<2x1xf32>
    %394 = vector.broadcast %386 : vector<2x1xf32> to vector<2x32xf32>
    %395 = arith.subf %380, %394 : vector<2x32xf32>
    %cst_138 = arith.constant 9.99999996E-13 : f32
    %396 = vector.broadcast %cst_138 : f32 to vector<2x1xf32>
    %397 = arith.addf %393, %396 : vector<2x1xf32>
    %398 = math.rsqrt %397 : vector<2x1xf32>
    %399 = vector.broadcast %398 : vector<2x1xf32> to vector<2x32xf32>
    %400 = arith.mulf %395, %399 : vector<2x32xf32>
    %401 = vector.broadcast %381 : vector<1x32xf32> to vector<2x32xf32>
    %402 = arith.mulf %400, %401 : vector<2x32xf32>
    %403 = vector.broadcast %382 : vector<1x32xf32> to vector<2x32xf32>
    %404 = arith.addf %402, %403 : vector<2x32xf32>
    %c0_139 = arith.constant 0 : index
    %c0_140 = arith.constant 0 : index
    %405 = vector.load %arg2[%c0_139, %c0_140] : memref<2x32xf32, #tpu.memory_space<vmem>>, vector<2x32xf32>
    tpu.vector_store %arg2[%c0_139, %c0_140], %404 {strides = array<i32>} : memref<2x32xf32, #tpu.memory_space<vmem>>, vector<2x32xf32>,
    return
  }
}

</mosaic_0001>

<bundles_post_ra>
// kernel: proxy_model_forward.1
= control target key start
LH: loop header
LB: loop body
LE: loop exit
PB: predicated region body
PF: predicated region fallthrough
CT: control target
= control target key end

     0   :  { %s2589_s0 = inlined_call_operand.vmem [shape: f32[42,64], index: 0, kind: input, shape index: {}]   ;;  %s2590_s1 = inlined_call_operand.vmem [shape: f32[592,96], index: 1, kind: input, shape index: {}]   ;;  %s2591_s2 = inlined_call_operand.hbm [shape: f32[2,32], index: 2, kind: output, shape index: {}]  }
   0x1   :  { %v25_v0 = vld [vmem:[%s2590_s1 + $0x38] sm:$0xff]  ;;  %v24_v1 = vld [vmem:[%s2590_s1 + $0x30] sm:$0xff]  ;;  %v23_v2 = vld [vmem:[%s2590_s1 + $0x28] sm:$0xff] }
   0x2   :  { %51 = vmatpush.msra.mxu0 %v25_v0  ;;  %v22_v3 = vld [vmem:[%s2590_s1 + $0x20] sm:$0xff]  ;;  %v21_v4 = vld [vmem:[%s2590_s1 + $0x18] sm:$0xff]  ;;  %v20_v5 = vld [vmem:[%s2590_s1 + $0x10] sm:$0xff] }
   0x4   :  { %52 = vmatpush.msra.mxu0 %v24_v1 }
   0x6   :  { %53 = vmatpush.msra.mxu0 %v23_v2 }
   0x8   :  { %54 = vmatpush.msra.mxu0 %v22_v3 }
   0xa   :  { %55 = vmatpush.msra.mxu0 %v21_v4 }
   0xb   :  { %7 = vsyncpa [#allocation3], 0  ;;  %v19_v6 = vld [vmem:[%s2590_s1 + $0x8] sm:$0xff]  ;;  %v18_v7 = vld [vmem:[%s2590_s1] sm:$0xff]  ;;  %vm30_vm0 = vcmask 523264   ;;  %vm74_vm1 = vcmask 261120  }
   0xc   :  { %56 = vmatpush.msra.mxu0 %v20_v5  ;;  %v12_v8 = vld [vmem:[%s2589_s0] sm:$0xff]  ;;  %v13_v9 = vld [vmem:[%s2589_s0 + $0x8] sm:$0xff]  ;;  %v14_v10 = vld [vmem:[%s2589_s0 + $0x10] sm:$0xff]  ;;  %vm111_vm2 = vcmask 254976   ;;  %v1944_v34 = vmov 32.0   ;;  %s1945_s6 = smov 96  }
   0xd   :  { %v15_v11 = vld [vmem:[%s2589_s0 + $0x18] sm:$0xff]  ;;  %v28_v16 = vld [vmem:[%s2590_s1 + $0x50] sm:$0xff]  ;;  %v27_v19 = vld [vmem:[%s2590_s1 + $0x48] sm:$0xff]  ;;  %1816 = vrcp.f32 %v1944_v34  ;;  %s1946_s7 = smov 88   ;;  %s1947_s8 = smov 120   ;;  %vm207_vm10 = vcmask 64512  }
   0xe   :  { %57 = vmatpush.msra.mxu0 %v19_v6  ;;  %v29_v15 = vld [vmem:[%s2590_s1 + $0x58] sm:$0xff]  ;;  %v26_v21 = vld [vmem:[%s2590_s1 + $0x40] sm:$0xff]  ;;  %v17_v25 = vld [vmem:[%s2589_s0 + $0x28] sm:$0x3]  ;;  %vm243_vm11 = vcmask 80896   ;;  %vm247_vm12 = vcmask 74752  }
   0xf   :  { %v16_v24 = vld [vmem:[%s2589_s0 + $0x20] sm:$0xff]  ;;  %v73_v30 = vld [vmem:[%s2590_s1 + $0x68] sm:$0x3]  ;;  %v167_v53 = vld [vmem:[%s2590_s1 + $0x98] sm:$0xff]  ;;  %s1948_s13 = smov 64   ;;  %s1949_s14 = smov 56  }
  0x10   :  { %58 = vmatpush.msra.mxu0 %v18_v7  ;;  %v72_v26 = vld [vmem:[%s2590_s1 + $0x60] sm:$0xff]  ;;  %v169_v51 = vld [vmem:[%s2590_s1 + $0xa8] sm:$0xff]  ;;  %v166_v54 = vld [vmem:[%s2590_s1 + $0x90] sm:$0xff]  ;;  %vm278_vm13 = vcmask 1041408   ;;  %s1950_s15 = smov 80   ;;  %s1951_s16 = smov 72  }
  0x11   :  { %1703 = vmatmul.msk.f32.vlgmr.msra.gmra.mxu0 %vm30_vm0, %v12_v8  ;;  %190 = vmatpush.msra.mxu2 %v169_v51  ;;  %v168_v52 = vld [vmem:[%s2590_s1 + $0xa0] sm:$0xff]  ;;  %s1952_s17 = smov 112   ;;  %s1953_s18 = smov 104   ;;  %vm633_vm14 = vcmask 130048   ;;  %vm636_vm15 = vcmask 195584  }
  0x12   :  { %v1798_v5 = vld [vmem:[%s2590_s1 + $0x80] ss:$0 sm:$0xff]  ;;  %s1954_s19 = smov 48   ;;  %s1955_s20 = smov 40  }
  0x13   :  { %v1817_v35 = vpop.eup %1816  ;;  %191 = vmatpush.msra.mxu2 %v168_v52  ;;  %s1956_s0 = smov 8   ;;  %s1957_s21 = smov 24  }
  0x14   :  { %v116_v36 = vmul.f32 32.0, %v1817_v35  ;;  %vm120_vm3 = vweird.f32 %v1817_v35  ;;  %s1958_s22 = smov 16   ;;  %s1960_s26 = smov [#allocation2]  }
  0x15   :  { %192 = vmatpush.msra.mxu2 %v167_v53  ;;  %s1692_s27 = sshll.u32 %s1960_s26, 4  ;;  %s1694_s30 = sshll.u32 %s2591_s2, 4  ;;  %s1693_s27 = int_to_ptr.vmem [resolvable:$true] %s1692_s27  ;;  %s1695_s30 = int_to_ptr.hbm [resolvable:$true] %s1694_s30 }
  0x16   :  { %v117_v37 = vsub.f32 1.0, %v116_v36 }
  0x17   :  { %193 = vmatpush.msra.mxu2 %v166_v54 }
  0x18   :  { %v118_v38 = vmul.f32 %v1817_v35, %v117_v37 }
  0x19   :  { %1704 = vmatmul.msk.f32.gmra.mxu0 %vm30_vm0, %v13_v9  ;;  %v1799_v9 = vld [vmem:[%s2590_s1 + $0x88] ss:$0 sm:$0xff] }
  0x1a   :  { %v119_v39 = vadd.f32 %v1817_v35, %v118_v38 }
  0x1c   :  { %v2050_v40 = vsel %vm120_vm3, %v1817_v35, %v119_v39 }
  0x21   :  { %1705 = vmatmul.msk.f32.gmra.mxu0 %vm30_vm0, %v14_v10 }
  0x29   :  { %1706 = vmatmul.msk.f32.gmra.mxu0 %vm30_vm0, %v15_v11 }
  0x8e   :  { %v60_v12 = vpop.f32.mrf.mxu0 }
  0x8f   :  { %v61_v23 = vadd.f32 %v60_v12, %v26_v21 }
  0x96   :  { %v63_v13 = vpop.f32.mrf.mxu0 }
  0x97   :  { %v64_v22 = vadd.f32 %v63_v13, %v27_v19  ;;  %v1800_v19 = vld [vmem:[%s2590_s1 + $0xb0] ss:$0 sm:$0xff] }
  0x9e   :  { %v66_v14 = vpop.f32.mrf.mxu0 }
  0x9f   :  { %v67_v20 = vadd.f32 %v66_v14, %v28_v16 }
  0xa6   :  { %v69_v17 = vpop.f32.mrf.mxu0 }
  0xa7   :  { %v70_v18 = vadd.f32 %v69_v17, %v29_v15 }
  0xa9   :  { %93 = vmatpush.msra.mxu1 %v70_v18 }
  0xab   :  { %94 = vmatpush.msra.mxu1 %v67_v20 }
  0xad   :  { %95 = vmatpush.msra.mxu1 %v64_v22 }
  0xaf   :  { %96 = vmatpush.msra.mxu1 %v61_v23 }
  0xb0   :  { %1707 = vmatmul.msk.f32.vlgmr.msra.gmra.mxu1 %vm74_vm1, %v16_v24 }
  0xb8   :  { %1708 = vmatmul.msk.f32.gmra.mxu1 %vm74_vm1, %v17_v25 }
 0x12d   :  { %v98_v27 = vpop.f32.mrf.mxu1 }
 0x12e   :  { %v2039_v28 = vadd.f32 %v98_v27, %v72_v26 }
 0x130   :  { %v108_v29 = vsel %vm74_vm1, %v2039_v28, 0.0 }
 0x131   :  { %109 = vadd.xlane.f32.xlu0 %v108_v29 }
 0x135   :  { %v101_v31 = vpop.f32.mrf.mxu1 }
 0x136   :  { %v2046_v32 = vadd.f32 %v101_v31, %v73_v30 }
 0x138   :  { %v112_v33 = vsel %vm111_vm2, %v2046_v32, 0.0 }
 0x139   :  { %113 = vadd.xlane.f32.xlu0 %v112_v33  ;;  %v2112_v33 = vld [vmem:[%s2590_s1 + $0x70] sm:$0xff] }
 0x1a4   :  { %v110_v41 = vpop.xlane.xlu0 %109 }
 0x1a5   :  { %v122_v42 = vmul.f32 %v2050_v40, %v110_v41 }
 0x1a7   :  { %v124_v43 = vsub.f32 %v2039_v28, %v122_v42 }
 0x1a9   :  { %v126_v44 = vmul.f32 %v124_v43, %v124_v43 }
 0x1ab   :  { %v128_v45 = vsel %vm74_vm1, %v126_v44, 0.0 }
 0x1ac   :  { %129 = vadd.xlane.f32.xlu1 %v128_v45  ;;  %v114_v46 = vpop.xlane.xlu0 %113 }
 0x1ad   :  { %v123_v47 = vmul.f32 %v2050_v40, %v114_v46 }
 0x1af   :  { %v125_v48 = vsub.f32 %v2046_v32, %v123_v47 }
 0x1b1   :  { %v127_v49 = vmul.f32 %v125_v48, %v125_v48 }
 0x1b3   :  { %v131_v50 = vsel %vm111_vm2, %v127_v49, 0.0 }
 0x1b4   :  { %132 = vadd.xlane.f32.xlu1 %v131_v50 }
 0x21f   :  { %v130_v55 = vpop.xlane.xlu1 %129 }
 0x220   :  { %v134_v56 = vmul.f32 %v130_v55, %v2050_v40 }
 0x222   :  { %v136_v57 = vadd.f32 1e-12, %v134_v56 }
 0x224   :  { %1818 = vrsqrt.f32 %v136_v57  ;;  %vm144_vm5 = vweird.f32 %v136_v57 }
 0x227   :  { %v133_v58 = vpop.xlane.xlu1 %132 }
 0x228   :  { %v135_v59 = vmul.f32 %v133_v58, %v2050_v40 }
 0x22a   :  { %v1819_v60 = vpop.eup %1818  ;;  %v137_v61 = vadd.f32 1e-12, %v135_v59 }
 0x22b   :  { %v139_v62 = vmul.f32 %v1819_v60, %v136_v57  ;;  %vm145_vm4 = vweird.f32 %v1819_v60 }
 0x22c   :  { %1820 = vrsqrt.f32 %v137_v61  ;;  %vm146_vm6 = vmor %vm144_vm5, %vm145_vm4  ;;  %vm154_vm8 = vweird.f32 %v137_v61 }
 0x22d   :  { %v140_v63 = vmul.f32 %v1819_v60, %v139_v62 }
 0x22f   :  { %v141_v0 = vmul.f32 0.5, %v140_v63 }
 0x231   :  { %v142_v1 = vsub.f32 1.5, %v141_v0 }
 0x232   :  { %v1821_v2 = vpop.eup %1820 }
 0x233   :  { %v143_v3 = vmul.f32 %v1819_v60, %v142_v1  ;;  %v149_v4 = vmul.f32 %v1821_v2, %v137_v61  ;;  %vm155_vm7 = vweird.f32 %v1821_v2 }
 0x234   :  { %vm156_vm9 = vmor %vm154_vm8, %vm155_vm7 }
 0x235   :  { %v147_v6 = vsel %vm146_vm6, %v1819_v60, %v143_v3  ;;  %v150_v7 = vmul.f32 %v1821_v2, %v149_v4 }
 0x236   :  { %v158_v8 = vmul.f32 %v147_v6, %v124_v43  ;;  %v2121_v43 = vld [vmem:[%s2590_s1 + $0x78] sm:$0x3] }
 0x237   :  { %v151_v10 = vmul.f32 0.5, %v150_v7 }
 0x238   :  { %v161_v11 = vmul.f32 %v1798_v5, %v158_v8 }
 0x239   :  { %v152_v12 = vsub.f32 1.5, %v151_v10 }
 0x23a   :  { %v164_v13 = vadd.f32 %v1799_v9, %v161_v11 }
 0x23b   :  { %v153_v14 = vmul.f32 %v1821_v2, %v152_v12 }
 0x23c   :  { %1709 = vmatmul.msk.f32.vlgmr.msra.gmra.mxu2 %vm74_vm1, %v164_v13 }
 0x23d   :  { %v157_v15 = vsel %vm156_vm9, %v1821_v2, %v153_v14 }
 0x23e   :  { %v159_v16 = vmul.f32 %v157_v15, %v125_v48 }
 0x240   :  { %v162_v17 = vmul.f32 %v1798_v5, %v159_v16 }
 0x242   :  { %v165_v18 = vadd.f32 %v1799_v9, %v162_v17 }
 0x244   :  { %1710 = vmatmul.msk.f32.gmra.mxu2 %vm74_vm1, %v165_v18 }
 0x2bf   :  { %v195_v20 = vpop.f32.mrf.mxu2 }
 0x2c0   :  { %v2083_v21 = vadd.f32 %v1800_v19, %v195_v20 }
 0x2c2   :  { %203 = vrot.lane.b32.xlu0 %v2083_v21, %s1945_s6  ;;  %308 = vrot.lane.b32.xlu1 %v2083_v21, %s1946_s7 }
 0x2c7   :  { %v198_v22 = vpop.f32.mrf.mxu2 }
 0x2c8   :  { %v2089_v23 = vadd.f32 %v1800_v19, %v198_v22 }
 0x2ca   :  { %205 = vrot.lane.b32.xlu2 %v2089_v23, %s1945_s6 }
 0x2d2   :  { %310 = vrot.lane.b32.xlu2 %v2089_v23, %s1946_s7 }
 0x2da   :  { %304 = vrot.lane.b32.xlu2 %v2083_v21, %s1947_s8 }
 0x2e2   :  { %306 = vrot.lane.b32.xlu2 %v2089_v23, %s1947_s8 }
 0x324   :  { %v206_v24 = vpop.permute.xlu2 %205 }
 0x325   :  { %1711 = vmatpush.xpose.msk.msra.mxu3 %vm207_vm10, %v206_v24 }
 0x32c   :  { %v311_v25 = vpop.permute.xlu2 %310 }
 0x32d   :  { %1718 = vmatpush.xpose.msk.msrb.mxu2 %vm207_vm10, %v311_v25 }
 0x334   :  { %v309_v26 = vpop.permute.xlu1 %308  ;;  %v305_v27 = vpop.permute.xlu2 %304 }
 0x335   :  { %v204_v29 = vpop.permute.xlu0 %203  ;;  %1719 = vmatpush.xpose.msk.msrb.mxu2 %vm207_vm10, %v309_v26 }
 0x336   :  { %1712 = vmatpush.xpose.msk.msra.mxu3 %vm207_vm10, %v204_v29 }
 0x338   :  { %1720 = vmatmul.msk.f32.vlgmr.msrb.gmra.mxu2 %vm207_vm10, %v305_v27 }
 0x339   :  { %1713 = vmatmul.msk.f32.vlgmr.msra.gmra.mxu3 %vm207_vm10, %v2083_v21 }
 0x33c   :  { %v307_v30 = vpop.permute.xlu2 %306 }
 0x340   :  { %1721 = vmatmul.msk.f32.gmra.mxu2 %vm207_vm10, %v307_v30 }
 0x341   :  { %1714 = vmatmul.msk.f32.gmra.mxu3 %vm207_vm10, %v2089_v23 }
 0x3bb   :  { %v337_v31 = vpop.f32.mrf.mxu2 }
 0x3bc   :  { %v233_v34 = vpop.f32.mrf.mxu3  ;;  %v343_v35 = vmul.f32 0.35355338, %v337_v31 }
 0x3bd   :  { %v239_v36 = vmul.f32 0.35355338, %v233_v34 }
 0x3be   :  { %v345_v37 = vadd.f32 %v343_v35, %v2112_v33 }
 0x3bf   :  { %v241_v38 = vadd.f32 %v239_v36, %v2112_v33 }
 0x3c0   :  { %v347_v39 = vsel %vm243_vm11, %v345_v37, -inf }
 0x3c1   :  { %348 = vmax.xlane.f32.xlu0 %v347_v39  ;;  %v244_v41 = vsel %vm243_vm11, %v241_v38, -inf }
 0x3c2   :  { %245 = vmax.xlane.f32.xlu2 %v244_v41 }
 0x3c3   :  { %v340_v47 = vpop.f32.mrf.mxu2 }
 0x3c4   :  { %v236_v42 = vpop.f32.mrf.mxu3  ;;  %v344_v48 = vmul.f32 0.35355338, %v340_v47 }
 0x3c5   :  { %v240_v44 = vmul.f32 0.35355338, %v236_v42 }
 0x3c6   :  { %v346_v49 = vadd.f32 %v344_v48, %v2121_v43 }
 0x3c7   :  { %v242_v45 = vadd.f32 %v240_v44, %v2121_v43 }
 0x3c8   :  { %v350_v50 = vsel %vm247_vm12, %v346_v49, -inf }
 0x3c9   :  { %v248_v46 = vsel %vm247_vm12, %v242_v45, -inf }
 0x3ca   :  { %249 = vmax.xlane.f32.xlu1 %v248_v46 }
 0x3d5   :  { %267 = vrot.lane.b32.xlu0 %v2083_v21, %s1948_s13 }
 0x3da   :  { %371 = vrot.lane.b32.xlu2 %v2089_v23, %s1949_s14 }
 0x3e3   :  { %269 = vrot.lane.b32.xlu1 %v2089_v23, %s1948_s13 }
 0x403   :  { %351 = vmax.xlane.f32.xlu2 %v350_v50 }
 0x434   :  { %v349_v51 = vpop.xlane.xlu0 %348 }
 0x435   :  { %v246_v52 = vpop.xlane.xlu2 %245  ;;  %v353_v53 = vsub.f32 %v345_v37, %v349_v51 }
 0x436   :  { %v251_v54 = vsub.f32 %v241_v38, %v246_v52 }
 0x437   :  { %v355_v55 = vmul.f32 1.442695, %v353_v53 }
 0x438   :  { %v253_v56 = vmul.f32 1.442695, %v251_v54 }
 0x439   :  { %1822 = vpow2.f32 %v355_v55 }
 0x43a   :  { %1824 = vpow2.f32 %v253_v56 }
 0x43d   :  { %v372_v57 = vpop.permute.xlu2 %371  ;;  %v250_v58 = vpop.xlane.xlu1 %249 }
 0x43e   :  { %v252_v59 = vsub.f32 %v242_v45, %v250_v58  ;;  %1722 = vmatpush.msk.msrb.mxu3 %vm278_vm13, %v372_v57 }
 0x43f   :  { %v1823_v60 = vpop.eup %1822 }
 0x440   :  { %v1825_v61 = vpop.eup %1824  ;;  %v255_v62 = vmul.f32 1.442695, %v252_v59  ;;  %v359_v63 = vsel %vm243_vm11, %v1823_v60, 0.0 }
 0x441   :  { %v257_v0 = vsel %vm243_vm11, %v1825_v61, 0.0  ;;  %360 = vadd.xlane.f32.xlu2 %v359_v63 }
 0x442   :  { %1826 = vpow2.f32 %v255_v62  ;;  %258 = vadd.xlane.f32.xlu0 %v257_v0 }
 0x447   :  { %v268_v4 = vpop.permute.xlu0 %267 }
 0x448   :  { %v1827_v1 = vpop.eup %1826 }
 0x449   :  { %v260_v2 = vsel %vm247_vm12, %v1827_v1, 0.0 }
 0x44a   :  { %261 = vadd.xlane.f32.xlu0 %v260_v2 }
 0x455   :  { %v270_v3 = vpop.permute.xlu1 %269 }
 0x456   :  { %1715 = vmatpush.msk.msrb.mxu1 %vm278_vm13, %v270_v3 }
 0x458   :  { %296 = vmatpush.msrb.mxu1 %v268_v4 }
 0x459   :  { %369 = vrot.lane.b32.xlu2 %v2083_v21, %s1949_s14 }
 0x45e   :  { %411 = vrot.lane.b32.xlu0 %v2089_v23, %s1950_s15 }
 0x461   :  { %512 = vrot.lane.b32.xlu2 %v2089_v23, %s1951_s16 }
 0x466   :  { %409 = vrot.lane.b32.xlu0 %v2083_v21, %s1950_s15 }
 0x469   :  { %510 = vrot.lane.b32.xlu2 %v2083_v21, %s1951_s16 }
 0x46e   :  { %405 = vrot.lane.b32.xlu0 %v2083_v21, %s1952_s17 }
 0x471   :  { %506 = vrot.lane.b32.xlu2 %v2083_v21, %s1953_s18 }
 0x476   :  { %v352_v5 = vpop.xlane.xlu2 %351  ;;  %407 = vrot.lane.b32.xlu0 %v2089_v23, %s1952_s17 }
 0x477   :  { %v354_v6 = vsub.f32 %v346_v49, %v352_v5 }
 0x479   :  { %v357_v7 = vmul.f32 1.442695, %v354_v6  ;;  %508 = vrot.lane.b32.xlu2 %v2089_v23, %s1953_s18 }
 0x47b   :  { %1828 = vpow2.f32 %v357_v7 }
 0x481   :  { %v1829_v8 = vpop.eup %1828 }
 0x482   :  { %v362_v9 = vsel %vm247_vm12, %v1829_v8, 0.0 }
 0x483   :  { %363 = vadd.xlane.f32.xlu1 %v362_v9 }
 0x4b4   :  { %v361_v10 = vpop.xlane.xlu2 %360 }
 0x4b5   :  { %1830 = vrcp.f32 %v361_v10  ;;  %v259_v11 = vpop.xlane.xlu0 %258 }
 0x4b6   :  { %1832 = vrcp.f32 %v259_v11 }
 0x4bb   :  { %v1831_v12 = vpop.eup %1830 }
 0x4bc   :  { %v1833_v13 = vpop.eup %1832  ;;  %v370_v14 = vpop.permute.xlu2 %369  ;;  %v367_v15 = vmul.f32 %v1831_v12, %v1823_v60 }
 0x4bd   :  { %v262_v16 = vpop.xlane.xlu0 %261  ;;  %397 = vmatpush.msrb.mxu3 %v370_v14  ;;  %v265_v17 = vmul.f32 %v1833_v13, %v1825_v61 }
 0x4be   :  { %1834 = vrcp.f32 %v262_v16  ;;  %1723 = vmatmul.msk.f32.vlgmr.msrb.gmra.mxu3 %vm243_vm11, %v367_v15 }
 0x4bf   :  { %1716 = vmatmul.msk.f32.vlgmr.msrb.gmra.mxu1 %vm243_vm11, %v265_v17 }
 0x4c4   :  { %v1835_v18 = vpop.eup %1834  ;;  %v513_v19 = vpop.permute.xlu2 %512 }
 0x4c5   :  { %1732 = vmatpush.xpose.msk.msra.mxu3 %vm207_vm10, %v513_v19  ;;  %v266_v20 = vmul.f32 %v1835_v18, %v1827_v1 }
 0x4c7   :  { %1717 = vmatmul.msk.f32.gmra.mxu1 %vm243_vm11, %v266_v20 }
 0x4cc   :  { %v511_v22 = vpop.permute.xlu2 %510 }
 0x4cd   :  { %1733 = vmatpush.xpose.msk.msra.mxu3 %vm207_vm10, %v511_v22 }
 0x4d0   :  { %v412_v24 = vpop.permute.xlu0 %411 }
 0x4d1   :  { %1725 = vmatpush.xpose.msk.msra.mxu1 %vm207_vm10, %v412_v24 }
 0x4d4   :  { %v507_v34 = vpop.permute.xlu2 %506 }
 0x4d8   :  { %v410_v25 = vpop.permute.xlu0 %409 }
 0x4d9   :  { %1726 = vmatpush.xpose.msk.msra.mxu1 %vm207_vm10, %v410_v25 }
 0x4dc   :  { %v509_v35 = vpop.permute.xlu2 %508 }
 0x4e0   :  { %v406_v26 = vpop.permute.xlu0 %405 }
 0x4e1   :  { %1727 = vmatmul.msk.f32.vlgmr.msra.gmra.mxu1 %vm207_vm10, %v406_v26 }
 0x4e8   :  { %v408_v27 = vpop.permute.xlu0 %407 }
 0x4e9   :  { %1728 = vmatmul.msk.f32.gmra.mxu1 %vm207_vm10, %v408_v27 }
 0x4f6   :  { %v364_v29 = vpop.xlane.xlu1 %363 }
 0x4f7   :  { %1836 = vrcp.f32 %v364_v29 }
 0x4fd   :  { %v1837_v30 = vpop.eup %1836 }
 0x4fe   :  { %v368_v31 = vmul.f32 %v1837_v30, %v1829_v8 }
 0x500   :  { %1724 = vmatmul.msk.f32.gmra.mxu3 %vm243_vm11, %v368_v31 }
 0x508   :  { %1734 = vmatmul.msk.f32.vlgmr.msra.gmra.mxu3 %vm207_vm10, %v507_v34 }
 0x510   :  { %1735 = vmatmul.msk.f32.gmra.mxu3 %vm207_vm10, %v509_v35  ;;  %v642_v35 = vld [vmem:[%s2590_s1 + $0xd0] sm:$0xff] }
 0x511   :  { %661 = vmatpush.msrb.mxu1 %v642_v35 }
 0x53c   :  { %v2169_v36 = vpop.f32.mrf.mxu1 }
 0x541   :  { %v399_v48 = vpop.f32.mrf.mxu3 }
 0x544   :  { %v2171_v37 = vpop.f32.mrf.mxu1 }
 0x55e   :  { %v438_v38 = vpop.f32.mrf.mxu1 }
 0x55f   :  { %v444_v39 = vmul.f32 0.35355338, %v438_v38  ;;  %v641_v38 = vld [vmem:[%s2590_s1 + $0xc8] sm:$0xff] }
 0x560   :  { %662 = vmatpush.msrb.mxu1 %v641_v38 }
 0x561   :  { %v446_v41 = vadd.f32 %v444_v39, %v2112_v33  ;;  %v640_v39 = vld [vmem:[%s2590_s1 + $0xc0] sm:$0xff] }
 0x562   :  { %663 = vmatpush.msrb.mxu1 %v640_v39 }
 0x563   :  { %v448_v42 = vsel %vm243_vm11, %v446_v41, -inf }
 0x564   :  { %449 = vmax.xlane.f32.xlu0 %v448_v42 }
 0x566   :  { %v441_v44 = vpop.f32.mrf.mxu1 }
 0x567   :  { %v445_v45 = vmul.f32 0.35355338, %v441_v44 }
 0x569   :  { %v447_v46 = vadd.f32 %v445_v45, %v2121_v43 }
 0x56b   :  { %v451_v47 = vsel %vm247_vm12, %v447_v46, -inf }
 0x56c   :  { %452 = vmax.xlane.f32.xlu2 %v451_v47 }
 0x583   :  { %v2177_v49 = vpop.f32.mrf.mxu3 }
 0x58b   :  { %v539_v50 = vpop.f32.mrf.mxu3 }
 0x58c   :  { %v545_v51 = vmul.f32 0.35355338, %v539_v50 }
 0x58e   :  { %v547_v52 = vadd.f32 %v545_v51, %v2112_v33 }
 0x590   :  { %v549_v53 = vsel %vm243_vm11, %v547_v52, -inf }
 0x591   :  { %550 = vmax.xlane.f32.xlu1 %v549_v53 }
 0x593   :  { %v542_v54 = vpop.f32.mrf.mxu3 }
 0x594   :  { %v546_v55 = vmul.f32 0.35355338, %v542_v54 }
 0x596   :  { %v548_v56 = vadd.f32 %v546_v55, %v2121_v43 }
 0x598   :  { %v552_v57 = vsel %vm247_vm12, %v548_v56, -inf }
 0x5aa   :  { %472 = vrot.lane.b32.xlu1 %v2089_v23, %s1954_s19 }
 0x5d4   :  { %553 = vmax.xlane.f32.xlu1 %v552_v57 }
 0x5d7   :  { %v450_v58 = vpop.xlane.xlu0 %449 }
 0x5d8   :  { %v454_v59 = vsub.f32 %v446_v41, %v450_v58  ;;  %v639_v41 = vld [vmem:[%s2590_s1 + $0xb8] sm:$0xff] }
 0x5d9   :  { %664 = vmatpush.msrb.mxu1 %v639_v41 }
 0x5da   :  { %v456_v60 = vmul.f32 1.442695, %v454_v59 }
 0x5dc   :  { %1838 = vpow2.f32 %v456_v60 }
 0x5df   :  { %v453_v61 = vpop.xlane.xlu2 %452 }
 0x5e0   :  { %v455_v33 = vsub.f32 %v447_v46, %v453_v61 }
 0x5e2   :  { %v1839_v62 = vpop.eup %1838  ;;  %v458_v63 = vmul.f32 1.442695, %v455_v33 }
 0x5e3   :  { %v460_v0 = vsel %vm243_vm11, %v1839_v62, 0.0 }
 0x5e4   :  { %1840 = vpow2.f32 %v458_v63  ;;  %461 = vadd.xlane.f32.xlu1 %v460_v0 }
 0x5ea   :  { %v1841_v1 = vpop.eup %1840 }
 0x5eb   :  { %v463_v2 = vsel %vm247_vm12, %v1841_v1, 0.0 }
 0x5ec   :  { %464 = vadd.xlane.f32.xlu2 %v463_v2 }
 0x5fd   :  { %573 = vrot.lane.b32.xlu1 %v2089_v23, %s1955_s20 }
 0x604   :  { %v551_v43 = vpop.xlane.xlu1 %550 }
 0x605   :  { %v555_v3 = vsub.f32 %v547_v52, %v551_v43  ;;  %571 = vrot.lane.b32.xlu1 %v2083_v21, %s1955_s20 }
 0x607   :  { %v557_v4 = vmul.f32 1.442695, %v555_v3 }
 0x609   :  { %1842 = vpow2.f32 %v557_v4  ;;  %v733_v4 = vld [vmem:[%s2590_s1 + $0x108] sm:$0xff] }
 0x60f   :  { %v1843_v5 = vpop.eup %1842 }
 0x610   :  { %v561_v6 = vsel %vm243_vm11, %v1843_v5, 0.0 }
 0x611   :  { %562 = vadd.xlane.f32.xlu0 %v561_v6  ;;  %v731_v6 = vld [vmem:[%s2590_s1 + $0xf8] sm:$0xff] }
 0x61c   :  { %v473_v7 = vpop.permute.xlu1 %472 }
 0x61d   :  { %1729 = vmatpush.msk.msra.mxu2 %vm278_vm13, %v473_v7  ;;  %v730_v7 = vld [vmem:[%s2590_s1 + $0xf0] sm:$0xff] }
 0x625   :  { %470 = vrot.lane.b32.xlu0 %v2083_v21, %s1954_s19 }
 0x647   :  { %v554_v8 = vpop.xlane.xlu1 %553 }
 0x648   :  { %v556_v9 = vsub.f32 %v548_v56, %v554_v8 }
 0x64a   :  { %v559_v23 = vmul.f32 1.442695, %v556_v9 }
 0x64c   :  { %1844 = vpow2.f32 %v559_v23 }
 0x652   :  { %v1845_v10 = vpop.eup %1844 }
 0x653   :  { %v564_v11 = vsel %vm247_vm12, %v1845_v10, 0.0 }
 0x654   :  { %565 = vadd.xlane.f32.xlu2 %v564_v11 }
 0x657   :  { %v462_v12 = vpop.xlane.xlu1 %461 }
 0x65f   :  { %v465_v17 = vpop.xlane.xlu2 %464 }
 0x66c   :  { %609 = vrot.lane.b32.xlu2 %v399_v48, %s1956_s0 }
 0x66f   :  { %v574_v13 = vpop.permute.xlu1 %573 }
 0x670   :  { %1736 = vmatpush.msk.msrb.mxu0 %vm278_vm13, %v574_v13 }
 0x677   :  { %v572_v14 = vpop.permute.xlu1 %571 }
 0x678   :  { %599 = vmatpush.msrb.mxu0 %v572_v14 }
 0x684   :  { %v563_v15 = vpop.xlane.xlu0 %562 }
 0x685   :  { %1846 = vrcp.f32 %v563_v15 }
 0x686   :  { %1848 = vrcp.f32 %v462_v12 }
 0x687   :  { %1850 = vrcp.f32 %v465_v17 }
 0x68b   :  { %v1847_v21 = vpop.eup %1846 }
 0x68c   :  { %v569_v16 = vmul.f32 %v1847_v21, %v1843_v5  ;;  %v1849_v18 = vpop.eup %1848  ;;  %v732_v5 = vld [vmem:[%s2590_s1 + $0x100] sm:$0xff] }
 0x68d   :  { %v468_v19 = vmul.f32 %v1849_v18, %v1839_v62  ;;  %v1851_v22 = vpop.eup %1850  ;;  %v1802_v21 = vld [vmem:[%s2590_s1 + $0xe0] ss:$0 sm:$0xff]  ;;  %v1803_v18 = vld [vmem:[%s2590_s1 + $0xe8] ss:$0 sm:$0xff] }
 0x68e   :  { %1737 = vmatmul.msk.f32.vlgmr.msrb.gmra.mxu0 %vm243_vm11, %v569_v16  ;;  %v469_v24 = vmul.f32 %v1851_v22, %v1841_v1 }
 0x697   :  { %v471_v20 = vpop.permute.xlu0 %470 }
 0x698   :  { %498 = vmatpush.msra.mxu2 %v471_v20 }
 0x699   :  { %1730 = vmatmul.msk.f32.vlgmr.msra.gmra.mxu2 %vm243_vm11, %v468_v19 }
 0x69a   :  { %754 = vmatpush.msrb.mxu2 %v733_v4 }
 0x69c   :  { %755 = vmatpush.msrb.mxu2 %v732_v5 }
 0x69e   :  { %756 = vmatpush.msrb.mxu2 %v731_v6 }
 0x6a0   :  { %757 = vmatpush.msrb.mxu2 %v730_v7 }
 0x6a1   :  { %1731 = vmatmul.msk.f32.gmra.mxu2 %vm243_vm11, %v469_v24 }
 0x6c7   :  { %v566_v25 = vpop.xlane.xlu2 %565 }
 0x6c8   :  { %1852 = vrcp.f32 %v566_v25 }
 0x6ce   :  { %v1853_v26 = vpop.eup %1852 }
 0x6cf   :  { %v570_v27 = vmul.f32 %v1853_v26, %v1845_v10  ;;  %v610_v42 = vpop.permute.xlu2 %609 }
 0x6d0   :  { %v631_v44 = vsel %vm207_vm10, %v2169_v36, %v610_v42  ;;  %v1801_v36 = vld [vmem:[%s2590_s1 + $0xd8] ss:$0 sm:$0xff]  ;;  %v1804_v42 = vld [vmem:[%s2590_s1 + $0x110] ss:$0 sm:$0xff] }
 0x6d1   :  { %1738 = vmatmul.msk.f32.gmra.mxu0 %vm243_vm11, %v570_v27 }
 0x70b   :  { %v601_v29 = vpop.f32.mrf.mxu0 }
 0x70c   :  { %625 = vrot.lane.b32.xlu0 %v601_v29, %s1957_s21 }
 0x71c   :  { %v500_v30 = vpop.f32.mrf.mxu2 }
 0x71d   :  { %617 = vrot.lane.b32.xlu1 %v500_v30, %s1958_s22 }
 0x724   :  { %v503_v31 = vpop.f32.mrf.mxu2 }
 0x725   :  { %611 = vrot.lane.b32.xlu1 %v2177_v49, %s1956_s0  ;;  %619 = vrot.lane.b32.xlu0 %v503_v31, %s1958_s22 }
 0x74e   :  { %v604_v34 = vpop.f32.mrf.mxu0 }
 0x74f   :  { %627 = vrot.lane.b32.xlu1 %v604_v34, %s1957_s21 }
 0x77e   :  { %v626_v46 = vpop.permute.xlu0 %625 }
 0x78f   :  { %v618_v45 = vpop.permute.xlu1 %617 }
 0x790   :  { %v634_v47 = vsel %vm633_vm14, %v631_v44, %v618_v45 }
 0x791   :  { %v637_v48 = vsel %vm636_vm15, %v634_v47, %v626_v46 }
 0x792   :  { %1739 = vmatmul.msk.f32.vlgmr.msrb.gmra.mxu1 %vm74_vm1, %v637_v48 }
 0x797   :  { %v612_v49 = vpop.permute.xlu1 %611  ;;  %v620_v51 = vpop.permute.xlu0 %619 }
 0x798   :  { %v632_v50 = vsel %vm207_vm10, %v2171_v37, %v612_v49 }
 0x799   :  { %v635_v52 = vsel %vm633_vm14, %v632_v50, %v620_v51  ;;  %v852_v50 = vld [vmem:[%s2590_s1 + $0x150] sm:$0xff]  ;;  %v851_v51 = vld [vmem:[%s2590_s1 + $0x148] sm:$0xff] }
 0x79a   :  { %867 = vmatpush.msrb.mxu3 %v852_v50 }
 0x79c   :  { %868 = vmatpush.msrb.mxu3 %v851_v51 }
 0x7c1   :  { %v628_v53 = vpop.permute.xlu1 %627 }
 0x7c2   :  { %v638_v54 = vsel %vm636_vm15, %v635_v52, %v628_v53  ;;  %v850_v52 = vld [vmem:[%s2590_s1 + $0x140] sm:$0xff]  ;;  %v849_v53 = vld [vmem:[%s2590_s1 + $0x138] sm:$0xff] }
 0x7c3   :  { %1740 = vmatmul.msk.f32.gmra.mxu1 %vm74_vm1, %v638_v54  ;;  %869 = vmatpush.msrb.mxu3 %v850_v52 }
 0x7c5   :  { %870 = vmatpush.msrb.mxu3 %v849_v53 }
 0x80f   :  { %v666_v55 = vpop.f32.mrf.mxu1 }
 0x810   :  { %v672_v56 = vadd.f32 %v666_v55, %v2039_v28 }
 0x812   :  { %v2234_v57 = vadd.f32 %v1801_v36, %v672_v56  ;;  %v847_v56 = vld [vmem:[%s2590_s1 + $0x128] sm:$0xff] }
 0x814   :  { %v680_v37 = vsel %vm74_vm1, %v2234_v57, 0.0 }
 0x815   :  { %681 = vadd.xlane.f32.xlu0 %v680_v37 }
 0x840   :  { %v669_v58 = vpop.f32.mrf.mxu1 }
 0x841   :  { %v673_v59 = vadd.f32 %v669_v58, %v2046_v32 }
 0x843   :  { %v2239_v60 = vadd.f32 %v1801_v36, %v673_v59  ;;  %v848_v36 = vld [vmem:[%s2590_s1 + $0x130] sm:$0xff]  ;;  %v846_v59 = vld [vmem:[%s2590_s1 + $0x120] sm:$0xff] }
 0x844   :  { %871 = vmatpush.msrb.mxu3 %v848_v36 }
 0x845   :  { %v683_v61 = vsel %vm111_vm2, %v2239_v60, 0.0 }
 0x846   :  { %684 = vadd.xlane.f32.xlu2 %v683_v61  ;;  %872 = vmatpush.msrb.mxu3 %v847_v56 }
 0x848   :  { %873 = vmatpush.msrb.mxu3 %v846_v59 }
 0x888   :  { %v682_v33 = vpop.xlane.xlu0 %681 }
 0x889   :  { %v686_v62 = vmul.f32 %v682_v33, %v2050_v40 }
 0x88b   :  { %v688_v28 = vsub.f32 %v2234_v57, %v686_v62  ;;  %v845_v62 = vld [vmem:[%s2590_s1 + $0x118] sm:$0xff] }
 0x88c   :  { %874 = vmatpush.msrb.mxu3 %v845_v62 }
 0x88d   :  { %v690_v63 = vmul.f32 %v688_v28, %v688_v28 }
 0x88f   :  { %v692_v0 = vsel %vm74_vm1, %v690_v63, 0.0 }
 0x890   :  { %693 = vadd.xlane.f32.xlu1 %v692_v0 }
 0x8b9   :  { %v685_v1 = vpop.xlane.xlu2 %684 }
 0x8ba   :  { %v687_v2 = vmul.f32 %v685_v1, %v2050_v40 }
 0x8bc   :  { %v689_v32 = vsub.f32 %v2239_v60, %v687_v2 }
 0x8be   :  { %v691_v43 = vmul.f32 %v689_v32, %v689_v32 }
 0x8c0   :  { %v695_v3 = vsel %vm111_vm2, %v691_v43, 0.0 }
 0x8c1   :  { %696 = vadd.xlane.f32.xlu0 %v695_v3 }
 0x903   :  { %v694_v8 = vpop.xlane.xlu1 %693 }
 0x904   :  { %v698_v9 = vmul.f32 %v694_v8, %v2050_v40 }
 0x906   :  { %v700_v23 = vadd.f32 1e-12, %v698_v9 }
 0x908   :  { %1854 = vrsqrt.f32 %v700_v23  ;;  %vm708_vm4 = vweird.f32 %v700_v23 }
 0x90e   :  { %v1855_v10 = vpop.eup %1854 }
 0x90f   :  { %v703_v11 = vmul.f32 %v1855_v10, %v700_v23  ;;  %vm709_vm3 = vweird.f32 %v1855_v10 }
 0x910   :  { %vm710_vm5 = vmor %vm708_vm4, %vm709_vm3 }
 0x911   :  { %v704_v12 = vmul.f32 %v1855_v10, %v703_v11 }
 0x913   :  { %v705_v13 = vmul.f32 0.5, %v704_v12 }
 0x915   :  { %v706_v14 = vsub.f32 1.5, %v705_v13 }
 0x917   :  { %v707_v15 = vmul.f32 %v1855_v10, %v706_v14  ;;  %v1959_v14 = vmov -1.0  }
 0x919   :  { %v711_v16 = vsel %vm710_vm5, %v1855_v10, %v707_v15 }
 0x91a   :  { %v722_v17 = vmul.f32 %v711_v16, %v688_v28 }
 0x91c   :  { %v725_v19 = vmul.f32 %v1802_v21, %v722_v17 }
 0x91e   :  { %v728_v20 = vadd.f32 %v1803_v18, %v725_v19 }
 0x920   :  { %1741 = vmatmul.msk.f32.vlgmr.msrb.gmra.mxu2 %vm74_vm1, %v728_v20 }
 0x934   :  { %v697_v22 = vpop.xlane.xlu0 %696 }
 0x935   :  { %v699_v24 = vmul.f32 %v697_v22, %v2050_v40 }
 0x937   :  { %v701_v25 = vadd.f32 1e-12, %v699_v24 }
 0x939   :  { %1856 = vrsqrt.f32 %v701_v25  ;;  %vm718_vm7 = vweird.f32 %v701_v25 }
 0x93f   :  { %v1857_v26 = vpop.eup %1856 }
 0x940   :  { %v713_v27 = vmul.f32 %v1857_v26, %v701_v25  ;;  %vm719_vm6 = vweird.f32 %v1857_v26 }
 0x941   :  { %vm720_vm8 = vmor %vm718_vm7, %vm719_vm6 }
 0x942   :  { %v714_v29 = vmul.f32 %v1857_v26, %v713_v27 }
 0x944   :  { %v715_v30 = vmul.f32 0.5, %v714_v29 }
 0x946   :  { %v716_v31 = vsub.f32 1.5, %v715_v30 }
 0x948   :  { %v717_v34 = vmul.f32 %v1857_v26, %v716_v31 }
 0x94a   :  { %v721_v35 = vsel %vm720_vm8, %v1857_v26, %v717_v34 }
 0x94b   :  { %v723_v38 = vmul.f32 %v721_v35, %v689_v32 }
 0x94d   :  { %v726_v39 = vmul.f32 %v1802_v21, %v723_v38 }
 0x94f   :  { %v729_v41 = vadd.f32 %v1803_v18, %v726_v39 }
 0x951   :  { %1742 = vmatmul.msk.f32.gmra.mxu2 %vm74_vm1, %v729_v41 }
 0x9a3   :  { %v759_v44 = vpop.f32.mrf.mxu2 }
 0x9a4   :  { %v760_v45 = vadd.f32 %v1804_v42, %v759_v44 }
 0x9a6   :  { %v767_v46 = vmul.f32 0.70710677, %v760_v45  ;;  %v765_v18 = vmul.f32 0.5, %v760_v45 }
 0x9a8   :  { %v773_v47 = vand.u32 2147483647, %v767_v46  ;;  %vm769_vm6 = vcmp.ge.f32.partialorder %v767_v46, 0.0 }
 0x9a9   :  { %v771_v15 = vsel %vm769_vm6, 1.0, %v1959_v14 }
 0x9aa   :  { %v775_v48 = vmul.f32 0.3275911, %v773_v47  ;;  %v827_v2 = vsub.f32 0.0, %v773_v47 }
 0x9ac   :  { %v777_v49 = vadd.f32 1.0, %v775_v48  ;;  %v829_v3 = vmul.f32 %v827_v2, %v773_v47 }
 0x9ae   :  { %1858 = vrcp.f32 %v777_v49  ;;  %v790_v58 = vand.u32 2147483648, %v777_v49  ;;  %v788_v33 = vand.u32 2147483647, %v777_v49  ;;  %vm784_vm3 = vweird.f32 %v777_v49 }
 0x9af   :  { %v831_v6 = vmul.f32 1.442695, %v829_v3 }
 0x9b0   :  { %v791_v63 = vor.u32 1.1754944e-38, %v790_v58  ;;  %vm789_vm5 = vcmp.eq.f32.partialorder %v788_v33, 8.507059e+37 }
 0x9b1   :  { %1860 = vpow2.f32 %v831_v6 }
 0x9b4   :  { %v1859_v54 = vpop.eup %1858 }
 0x9b5   :  { %v780_v55 = vmul.f32 %v1859_v54, %v777_v49  ;;  %vm785_vm9 = vweird.f32 %v1859_v54 }
 0x9b6   :  { %vm786_vm4 = vmor %vm784_vm3, %vm785_vm9 }
 0x9b7   :  { %v781_v37 = vsub.f32 1.0, %v780_v55  ;;  %v1861_v11 = vpop.eup %1860 }
 0x9b9   :  { %v782_v61 = vmul.f32 %v1859_v54, %v781_v37 }
 0x9bb   :  { %v783_v28 = vadd.f32 %v1859_v54, %v782_v61 }
 0x9bd   :  { %v787_v0 = vsel %vm786_vm4, %v1859_v54, %v783_v28  ;;  %v1805_v28 = vld [vmem:[%s2590_s1 + $0x158] ss:$0 sm:$0xff] }
 0x9be   :  { %v792_v1 = vsel %vm789_vm5, %v791_v63, %v787_v0 }
 0x9bf   :  { %v809_v32 = vmul.f32 1.0614054, %v792_v1 }
 0x9c1   :  { %v811_v43 = vadd.f32 -1.4531521, %v809_v32 }
 0x9c3   :  { %v813_v4 = vmul.f32 %v811_v43, %v792_v1 }
 0x9c5   :  { %v815_v5 = vadd.f32 1.4214138, %v813_v4 }
 0x9c7   :  { %v817_v7 = vmul.f32 %v815_v5, %v792_v1 }
 0x9c9   :  { %v819_v8 = vadd.f32 -0.28449672, %v817_v7 }
 0x9cb   :  { %v821_v9 = vmul.f32 %v819_v8, %v792_v1 }
 0x9cd   :  { %v823_v23 = vadd.f32 0.2548296, %v821_v9 }
 0x9cf   :  { %v825_v10 = vmul.f32 %v823_v23, %v792_v1 }
 0x9d1   :  { %v835_v12 = vmul.f32 %v1861_v11, %v825_v10 }
 0x9d3   :  { %v837_v13 = vsub.f32 1.0, %v835_v12  ;;  %v943_v12 = vld [vmem:[%s2590_s1 + $0x188] sm:$0xff] }
 0x9d4   :  { %v762_v21 = vpop.f32.mrf.mxu2  ;;  %964 = vmatpush.msra.mxu0 %v943_v12  ;;  %v2403_v12 = vld [vmem:[%s2590_s1 + $0x78] sm:$0x3] }
 0x9d5   :  { %v839_v16 = vmul.f32 %v837_v13, %v771_v15  ;;  %v763_v17 = vadd.f32 %v1804_v42, %v762_v21  ;;  %v942_v13 = vld [vmem:[%s2590_s1 + $0x180] sm:$0xff]  ;;  %v941_v15 = vld [vmem:[%s2590_s1 + $0x178] sm:$0xff]  ;;  %v940_v21 = vld [vmem:[%s2590_s1 + $0x170] sm:$0xff] }
 0x9d6   :  { %965 = vmatpush.msra.mxu0 %v942_v13 }
 0x9d7   :  { %v841_v19 = vadd.f32 1.0, %v839_v16  ;;  %v768_v20 = vmul.f32 0.70710677, %v763_v17  ;;  %v766_v61 = vmul.f32 0.5, %v763_v17 }
 0x9d8   :  { %966 = vmatpush.msra.mxu0 %v941_v15 }
 0x9d9   :  { %v843_v22 = vmul.f32 %v841_v19, %v765_v18  ;;  %v774_v24 = vand.u32 2147483647, %v768_v20  ;;  %vm770_vm4 = vcmp.ge.f32.partialorder %v768_v20, 0.0 }
 0x9da   :  { %v772_v58 = vsel %vm770_vm4, 1.0, %v1959_v14  ;;  %967 = vmatpush.msra.mxu0 %v940_v21 }
 0x9db   :  { %v776_v25 = vmul.f32 0.3275911, %v774_v24  ;;  %1743 = vmatmul.msk.f32.vlgmr.msrb.gmra.mxu3 %vm30_vm0, %v843_v22  ;;  %v828_v42 = vsub.f32 0.0, %v774_v24 }
 0x9dd   :  { %v778_v26 = vadd.f32 1.0, %v776_v25  ;;  %v830_v47 = vmul.f32 %v828_v42, %v774_v24 }
 0x9df   :  { %1862 = vrcp.f32 %v778_v26  ;;  %v805_v31 = vand.u32 2147483648, %v778_v26  ;;  %v803_v35 = vand.u32 2147483647, %v778_v26  ;;  %vm799_vm8 = vweird.f32 %v778_v26 }
 0x9e0   :  { %v833_v50 = vmul.f32 1.442695, %v830_v47 }
 0x9e1   :  { %v806_v39 = vor.u32 1.1754944e-38, %v805_v31  ;;  %vm804_vm3 = vcmp.eq.f32.partialorder %v803_v35, 8.507059e+37  ;;  %v1807_v31 = vld [vmem:[%s2590_s1 + $0x168] ss:$0 sm:$0xff] }
 0x9e2   :  { %1864 = vpow2.f32 %v833_v50 }
 0x9e5   :  { %v1863_v27 = vpop.eup %1862 }
 0x9e6   :  { %v795_v29 = vmul.f32 %v1863_v27, %v778_v26  ;;  %vm800_vm7 = vweird.f32 %v1863_v27 }
 0x9e7   :  { %vm801_vm9 = vmor %vm799_vm8, %vm800_vm7 }
 0x9e8   :  { %v796_v30 = vsub.f32 1.0, %v795_v29  ;;  %v1865_v55 = vpop.eup %1864 }
 0x9ea   :  { %v797_v34 = vmul.f32 %v1863_v27, %v796_v30 }
 0x9ec   :  { %v798_v38 = vadd.f32 %v1863_v27, %v797_v34 }
 0x9ee   :  { %v802_v41 = vsel %vm801_vm9, %v1863_v27, %v798_v38  ;;  %v1806_v27 = vld [vmem:[%s2590_s1 + $0x160] ss:$0 sm:$0xff] }
 0x9ef   :  { %v807_v44 = vsel %vm804_vm3, %v806_v39, %v802_v41 }
 0x9f0   :  { %v810_v45 = vmul.f32 1.0614054, %v807_v44 }
 0x9f2   :  { %v812_v46 = vadd.f32 -1.4531521, %v810_v45 }
 0x9f4   :  { %v814_v48 = vmul.f32 %v812_v46, %v807_v44 }
 0x9f6   :  { %v816_v49 = vadd.f32 1.4214138, %v814_v48 }
 0x9f8   :  { %v818_v51 = vmul.f32 %v816_v49, %v807_v44 }
 0x9fa   :  { %v820_v52 = vadd.f32 -0.28449672, %v818_v51 }
 0x9fc   :  { %v822_v53 = vmul.f32 %v820_v52, %v807_v44 }
 0x9fe   :  { %v824_v54 = vadd.f32 0.2548296, %v822_v53  ;;  %v1808_v53 = vld [vmem:[%s2590_s1 + $0x190] ss:$0 sm:$0xff] }
 0xa00   :  { %v826_v36 = vmul.f32 %v824_v54, %v807_v44 }
 0xa02   :  { %v836_v56 = vmul.f32 %v1865_v55, %v826_v36 }
 0xa04   :  { %v838_v37 = vsub.f32 1.0, %v836_v56 }
 0xa06   :  { %v840_v59 = vmul.f32 %v838_v37, %v772_v58 }
 0xa08   :  { %v842_v33 = vadd.f32 1.0, %v840_v59 }
 0xa0a   :  { %v844_v62 = vmul.f32 %v842_v33, %v766_v61 }
 0xa0c   :  { %1744 = vmatmul.msk.f32.gmra.mxu3 %vm30_vm0, %v844_v62 }
 0xa5e   :  { %v876_v63 = vpop.f32.mrf.mxu3 }
 0xa5f   :  { %v882_v0 = vadd.f32 %v876_v63, %v2234_v57 }
 0xa61   :  { %v2306_v1 = vadd.f32 %v1805_v28, %v882_v0 }
 0xa63   :  { %v890_v2 = vsel %vm74_vm1, %v2306_v1, 0.0 }
 0xa64   :  { %891 = vadd.xlane.f32.xlu2 %v890_v2 }
 0xa8f   :  { %v879_v32 = vpop.f32.mrf.mxu3 }
 0xa90   :  { %v883_v43 = vadd.f32 %v879_v32, %v2239_v60 }
 0xa92   :  { %v2311_v3 = vadd.f32 %v1805_v28, %v883_v43 }
 0xa94   :  { %v893_v4 = vsel %vm111_vm2, %v2311_v3, 0.0 }
 0xa95   :  { %894 = vadd.xlane.f32.xlu1 %v893_v4 }
 0xad7   :  { %v892_v5 = vpop.xlane.xlu2 %891 }
 0xad8   :  { %v896_v6 = vmul.f32 %v892_v5, %v2050_v40 }
 0xada   :  { %v898_v57 = vsub.f32 %v2306_v1, %v896_v6 }
 0xadc   :  { %v900_v7 = vmul.f32 %v898_v57, %v898_v57 }
 0xade   :  { %v902_v8 = vsel %vm74_vm1, %v900_v7, 0.0  ;;  %v1916_v7 = vld [vmem:[%s2590_s1 + $0x70] sm:$0xff] }
 0xadf   :  { %903 = vadd.xlane.f32.xlu0 %v902_v8 }
 0xb08   :  { %v895_v9 = vpop.xlane.xlu1 %894 }
 0xb09   :  { %v897_v23 = vmul.f32 %v895_v9, %v2050_v40 }
 0xb0b   :  { %v899_v60 = vsub.f32 %v2311_v3, %v897_v23 }
 0xb0d   :  { %v901_v10 = vmul.f32 %v899_v60, %v899_v60 }
 0xb0f   :  { %v905_v11 = vsel %vm111_vm2, %v901_v10, 0.0 }
 0xb10   :  { %906 = vadd.xlane.f32.xlu2 %v905_v11 }
 0xb52   :  { %v904_v16 = vpop.xlane.xlu0 %903 }
 0xb53   :  { %v908_v17 = vmul.f32 %v904_v16, %v2050_v40 }
 0xb55   :  { %v910_v18 = vadd.f32 1e-12, %v908_v17 }
 0xb57   :  { %1866 = vrsqrt.f32 %v910_v18  ;;  %vm918_vm6 = vweird.f32 %v910_v18 }
 0xb5d   :  { %v1867_v19 = vpop.eup %1866 }
 0xb5e   :  { %v913_v20 = vmul.f32 %v1867_v19, %v910_v18  ;;  %vm919_vm5 = vweird.f32 %v1867_v19 }
 0xb5f   :  { %vm920_vm7 = vmor %vm918_vm6, %vm919_vm5 }
 0xb60   :  { %v914_v22 = vmul.f32 %v1867_v19, %v913_v20 }
 0xb62   :  { %v915_v24 = vmul.f32 0.5, %v914_v22 }
 0xb64   :  { %v916_v25 = vsub.f32 1.5, %v915_v24 }
 0xb66   :  { %v917_v26 = vmul.f32 %v1867_v19, %v916_v25 }
 0xb68   :  { %v921_v29 = vsel %vm920_vm7, %v1867_v19, %v917_v26 }
 0xb69   :  { %v932_v30 = vmul.f32 %v921_v29, %v898_v57 }
 0xb6b   :  { %v935_v34 = vmul.f32 %v1806_v27, %v932_v30 }
 0xb6d   :  { %v938_v35 = vadd.f32 %v1807_v31, %v935_v34 }
 0xb6f   :  { %1745 = vmatmul.msk.f32.vlgmr.msra.gmra.mxu0 %vm74_vm1, %v938_v35 }
 0xb83   :  { %v907_v38 = vpop.xlane.xlu2 %906 }
 0xb84   :  { %v909_v39 = vmul.f32 %v907_v38, %v2050_v40 }
 0xb86   :  { %v911_v41 = vadd.f32 1e-12, %v909_v39 }
 0xb88   :  { %1868 = vrsqrt.f32 %v911_v41  ;;  %vm928_vm9 = vweird.f32 %v911_v41 }
 0xb8e   :  { %v1869_v42 = vpop.eup %1868 }
 0xb8f   :  { %v923_v44 = vmul.f32 %v1869_v42, %v911_v41  ;;  %vm929_vm8 = vweird.f32 %v1869_v42 }
 0xb90   :  { %vm930_vm3 = vmor %vm928_vm9, %vm929_vm8 }
 0xb91   :  { %v924_v45 = vmul.f32 %v1869_v42, %v923_v44 }
 0xb93   :  { %v925_v46 = vmul.f32 0.5, %v924_v45 }
 0xb95   :  { %v926_v47 = vsub.f32 1.5, %v925_v46 }
 0xb97   :  { %v927_v48 = vmul.f32 %v1869_v42, %v926_v47 }
 0xb99   :  { %v931_v49 = vsel %vm930_vm3, %v1869_v42, %v927_v48 }
 0xb9a   :  { %v933_v50 = vmul.f32 %v931_v49, %v899_v60 }
 0xb9c   :  { %v936_v51 = vmul.f32 %v1806_v27, %v933_v50 }
 0xb9e   :  { %v939_v52 = vadd.f32 %v1807_v31, %v936_v51 }
 0xba0   :  { %1746 = vmatmul.msk.f32.gmra.mxu0 %vm74_vm1, %v939_v52 }
 0xbec   :  { %v969_v54 = vpop.f32.mrf.mxu0 }
 0xbed   :  { %v2346_v36 = vadd.f32 %v1808_v53, %v969_v54 }
 0xbef   :  { %977 = vrot.lane.b32.xlu2 %v2346_v36, %s1945_s6 }
 0xbf7   :  { %1179 = vrot.lane.b32.xlu2 %v2346_v36, %s1950_s15 }
 0xc1d   :  { %v972_v55 = vpop.f32.mrf.mxu0 }
 0xc1e   :  { %v2352_v56 = vadd.f32 %v1808_v53, %v972_v55 }
 0xc20   :  { %1080 = vrot.lane.b32.xlu0 %v2352_v56, %s1946_s7  ;;  %979 = vrot.lane.b32.xlu1 %v2352_v56, %s1945_s6 }
 0xc21   :  { %1076 = vrot.lane.b32.xlu2 %v2352_v56, %s1947_s8 }
 0xc28   :  { %1074 = vrot.lane.b32.xlu1 %v2346_v36, %s1947_s8  ;;  %1078 = vrot.lane.b32.xlu0 %v2346_v36, %s1946_s7 }
 0xc29   :  { %1276 = vrot.lane.b32.xlu2 %v2346_v36, %s1953_s18 }
 0xc30   :  { %1282 = vrot.lane.b32.xlu1 %v2352_v56, %s1951_s16  ;;  %1181 = vrot.lane.b32.xlu0 %v2352_v56, %s1950_s15 }
 0xc38   :  { %1175 = vrot.lane.b32.xlu1 %v2346_v36, %s1952_s17  ;;  %1280 = vrot.lane.b32.xlu0 %v2346_v36, %s1951_s16 }
 0xc40   :  { %1278 = vrot.lane.b32.xlu1 %v2352_v56, %s1953_s18  ;;  %1177 = vrot.lane.b32.xlu0 %v2352_v56, %s1952_s17 }
 0xc49   :  { %v978_v37 = vpop.permute.xlu2 %977 }
 0xc51   :  { %v1180_v62 = vpop.permute.xlu2 %1179 }
 0xc7b   :  { %v1077_v0 = vpop.permute.xlu2 %1076 }
 0xc83   :  { %v1277_v43 = vpop.permute.xlu2 %1276 }
 0xc92   :  { %v1081_v58 = vpop.permute.xlu0 %1080  ;;  %v980_v59 = vpop.permute.xlu1 %979 }
 0xc93   :  { %1747 = vmatpush.xpose.msk.msra.mxu1 %vm207_vm10, %v980_v59  ;;  %1754 = vmatpush.xpose.msk.msra.mxu3 %vm207_vm10, %v1081_v58 }
 0xc97   :  { %1748 = vmatpush.xpose.msk.msra.mxu1 %vm207_vm10, %v978_v37 }
 0xc9a   :  { %v1075_v61 = vpop.permute.xlu1 %1074  ;;  %v1079_v33 = vpop.permute.xlu0 %1078  ;;  %1749 = vmatmul.msk.f32.vlgmr.msra.gmra.mxu1 %vm207_vm10, %v2346_v36 }
 0xc9b   :  { %1755 = vmatpush.xpose.msk.msra.mxu3 %vm207_vm10, %v1079_v33 }
 0xc9e   :  { %1756 = vmatmul.msk.f32.vlgmr.msra.gmra.mxu3 %vm207_vm10, %v1075_v61 }
 0xca2   :  { %v1283_v28 = vpop.permute.xlu1 %1282  ;;  %v1182_v63 = vpop.permute.xlu0 %1181  ;;  %1750 = vmatmul.msk.f32.gmra.mxu1 %vm207_vm10, %v2352_v56 }
 0xca3   :  { %1761 = vmatpush.xpose.msk.msrb.mxu1 %vm207_vm10, %v1182_v63  ;;  %1768 = vmatpush.xpose.msk.msrb.mxu3 %vm207_vm10, %v1283_v28 }
 0xca6   :  { %1757 = vmatmul.msk.f32.gmra.mxu3 %vm207_vm10, %v1077_v0 }
 0xca7   :  { %1762 = vmatpush.xpose.msk.msrb.mxu1 %vm207_vm10, %v1180_v62 }
 0xcaa   :  { %v1176_v2 = vpop.permute.xlu1 %1175  ;;  %v1281_v32 = vpop.permute.xlu0 %1280 }
 0xcab   :  { %1763 = vmatmul.msk.f32.vlgmr.msrb.gmra.mxu1 %vm207_vm10, %v1176_v2  ;;  %1769 = vmatpush.xpose.msk.msrb.mxu3 %vm207_vm10, %v1281_v32 }
 0xcae   :  { %1770 = vmatmul.msk.f32.vlgmr.msrb.gmra.mxu3 %vm207_vm10, %v1277_v43 }
 0xcb2   :  { %v1178_v4 = vpop.permute.xlu0 %1177  ;;  %v1279_v5 = vpop.permute.xlu1 %1278 }
 0xcb3   :  { %1764 = vmatmul.msk.f32.gmra.mxu1 %vm207_vm10, %v1178_v4 }
 0xcb6   :  { %1771 = vmatmul.msk.f32.gmra.mxu3 %vm207_vm10, %v1279_v5 }
 0xd17   :  { %v1006_v6 = vpop.f32.mrf.mxu1 }
 0xd18   :  { %v1012_v57 = vmul.f32 0.35355338, %v1006_v6 }
 0xd1a   :  { %v1014_v8 = vadd.f32 %v1916_v7, %v1012_v57 }
 0xd1c   :  { %v1016_v9 = vsel %vm243_vm11, %v1014_v8, -inf }
 0xd1d   :  { %1017 = vmax.xlane.f32.xlu2 %v1016_v9 }
 0xd1f   :  { %v1009_v23 = vpop.f32.mrf.mxu1 }
 0xd20   :  { %v1013_v60 = vmul.f32 0.35355338, %v1009_v23 }
 0xd21   :  { %v1107_v10 = vpop.f32.mrf.mxu3 }
 0xd22   :  { %v1113_v11 = vmul.f32 0.35355338, %v1107_v10  ;;  %v1015_v13 = vadd.f32 %v2403_v12, %v1013_v60 }
 0xd24   :  { %v1019_v15 = vsel %vm247_vm12, %v1015_v13, -inf  ;;  %v1115_v21 = vadd.f32 %v1916_v7, %v1113_v11 }
 0xd25   :  { %1020 = vmax.xlane.f32.xlu1 %v1019_v15 }
 0xd26   :  { %v1117_v16 = vsel %vm243_vm11, %v1115_v21, -inf }
 0xd27   :  { %1118 = vmax.xlane.f32.xlu0 %v1117_v16 }
 0xd28   :  { %v1208_v17 = vpop.f32.mrf.mxu1 }
 0xd29   :  { %v1214_v18 = vmul.f32 0.35355338, %v1208_v17  ;;  %v1110_v19 = vpop.f32.mrf.mxu3 }
 0xd2a   :  { %v1114_v20 = vmul.f32 0.35355338, %v1110_v19 }
 0xd2b   :  { %v1216_v22 = vadd.f32 %v1916_v7, %v1214_v18 }
 0xd2c   :  { %v1116_v24 = vadd.f32 %v2403_v12, %v1114_v20 }
 0xd2d   :  { %v1218_v25 = vsel %vm243_vm11, %v1216_v22, -inf }
 0xd2e   :  { %v1120_v26 = vsel %vm247_vm12, %v1116_v24, -inf }
 0xd2f   :  { %1219 = vmax.xlane.f32.xlu0 %v1218_v25  ;;  %1121 = vmax.xlane.f32.xlu2 %v1120_v26 }
 0xd30   :  { %v1211_v23 = vpop.f32.mrf.mxu1 }
 0xd31   :  { %v1309_v27 = vpop.f32.mrf.mxu3  ;;  %v1215_v60 = vmul.f32 0.35355338, %v1211_v23 }
 0xd32   :  { %v1315_v29 = vmul.f32 0.35355338, %v1309_v27 }
 0xd34   :  { %v1317_v30 = vadd.f32 %v1916_v7, %v1315_v29 }
 0xd36   :  { %v1319_v31 = vsel %vm243_vm11, %v1317_v30, -inf }
 0xd37   :  { %1320 = vmax.xlane.f32.xlu1 %v1319_v31 }
 0xd39   :  { %v1312_v57 = vpop.f32.mrf.mxu3 }
 0xd3a   :  { %v1316_v7 = vmul.f32 0.35355338, %v1312_v57 }
 0xd3c   :  { %v1318_v9 = vadd.f32 %v2403_v12, %v1316_v7 }
 0xd3e   :  { %v1322_v10 = vsel %vm247_vm12, %v1318_v9, -inf }
 0xd43   :  { %1040 = vrot.lane.b32.xlu0 %v2352_v56, %s1948_s13 }
 0xd47   :  { %1141 = vrot.lane.b32.xlu2 %v2352_v56, %s1949_s14 }
 0xd4f   :  { %1139 = vrot.lane.b32.xlu2 %v2346_v36, %s1949_s14 }
 0xd50   :  { %1038 = vrot.lane.b32.xlu1 %v2346_v36, %s1948_s13 }
 0xd90   :  { %v1018_v34 = vpop.xlane.xlu2 %1017 }
 0xd91   :  { %v1022_v35 = vsub.f32 %v1014_v8, %v1018_v34 }
 0xd93   :  { %v1024_v38 = vmul.f32 1.442695, %v1022_v35 }
 0xd95   :  { %1870 = vpow2.f32 %v1024_v38 }
 0xd98   :  { %v1021_v39 = vpop.xlane.xlu1 %1020 }
 0xd99   :  { %v1023_v41 = vsub.f32 %v1015_v13, %v1021_v39 }
 0xd9a   :  { %v1119_v42 = vpop.xlane.xlu0 %1118 }
 0xd9b   :  { %v1871_v44 = vpop.eup %1870  ;;  %v1026_v45 = vmul.f32 1.442695, %v1023_v41  ;;  %v1123_v46 = vsub.f32 %v1115_v21, %v1119_v42 }
 0xd9c   :  { %v1028_v47 = vsel %vm243_vm11, %v1871_v44, 0.0 }
 0xd9d   :  { %1872 = vpow2.f32 %v1026_v45  ;;  %v1125_v48 = vmul.f32 1.442695, %v1123_v46  ;;  %1029 = vadd.xlane.f32.xlu2 %v1028_v47 }
 0xd9f   :  { %1874 = vpow2.f32 %v1125_v48 }
 0xda2   :  { %v1220_v49 = vpop.xlane.xlu0 %1219  ;;  %v1122_v50 = vpop.xlane.xlu2 %1121 }
 0xda3   :  { %v1873_v51 = vpop.eup %1872  ;;  %v1224_v52 = vsub.f32 %v1216_v22, %v1220_v49  ;;  %v1124_v53 = vsub.f32 %v1116_v24, %v1122_v50 }
 0xda4   :  { %v1031_v54 = vsel %vm247_vm12, %v1873_v51, 0.0 }
 0xda5   :  { %v1875_v55 = vpop.eup %1874  ;;  %v1226_v37 = vmul.f32 1.442695, %v1224_v52  ;;  %v1127_v58 = vmul.f32 1.442695, %v1124_v53  ;;  %1032 = vadd.xlane.f32.xlu2 %v1031_v54 }
 0xda6   :  { %v1129_v59 = vsel %vm243_vm11, %v1875_v55, 0.0 }
 0xda7   :  { %1876 = vpow2.f32 %v1226_v37  ;;  %1130 = vadd.xlane.f32.xlu1 %v1129_v59 }
 0xda8   :  { %1878 = vpow2.f32 %v1127_v58 }
 0xdaa   :  { %v1142_v61 = vpop.permute.xlu2 %1141  ;;  %v1321_v32 = vpop.xlane.xlu1 %1320 }
 0xdab   :  { %1758 = vmatpush.msk.msrb.mxu0 %vm278_vm13, %v1142_v61  ;;  %v1325_v4 = vsub.f32 %v1317_v30, %v1321_v32  ;;  %v1408_v32 = vld [vmem:[%s2590_s1 + $0x1a0] sm:$0xff] }
 0xdad   :  { %v1877_v33 = vpop.eup %1876  ;;  %v1327_v5 = vmul.f32 1.442695, %v1325_v4 }
 0xdae   :  { %v1879_v62 = vpop.eup %1878  ;;  %v1230_v28 = vsel %vm243_vm11, %v1877_v33, 0.0 }
 0xdaf   :  { %1231 = vadd.xlane.f32.xlu1 %v1230_v28  ;;  %v1132_v63 = vsel %vm247_vm12, %v1879_v62, 0.0  ;;  %1880 = vpow2.f32 %v1327_v5 }
 0xdb0   :  { %1133 = vadd.xlane.f32.xlu0 %v1132_v63 }
 0xdb2   :  { %v1140_v0 = vpop.permute.xlu2 %1139 }
 0xdb3   :  { %1167 = vmatpush.msrb.mxu0 %v1140_v0  ;;  %v1410_v0 = vld [vmem:[%s2590_s1 + $0x1b0] sm:$0xff] }
 0xdb4   :  { %1429 = vmatpush.msra.mxu1 %v1410_v0 }
 0xdb5   :  { %v1041_v2 = vpop.permute.xlu0 %1040  ;;  %v1881_v6 = vpop.eup %1880 }
 0xdb6   :  { %1751 = vmatpush.msk.msra.mxu2 %vm278_vm13, %v1041_v2  ;;  %v1331_v8 = vsel %vm243_vm11, %v1881_v6, 0.0  ;;  %v1409_v2 = vld [vmem:[%s2590_s1 + $0x1a8] sm:$0xff] }
 0xdb7   :  { %1430 = vmatpush.msra.mxu1 %v1409_v2  ;;  %v1620_v2 = vld [vmem:[%s2590_s1 + $0x230] sm:$0xff] }
 0xdb8   :  { %1635 = vmatpush.msra.mxu3 %v1620_v2 }
 0xdb9   :  { %1431 = vmatpush.msra.mxu1 %v1408_v32  ;;  %v1619_v32 = vld [vmem:[%s2590_s1 + $0x228] sm:$0xff] }
 0xdba   :  { %1636 = vmatpush.msra.mxu3 %v1619_v32 }
 0xdbd   :  { %1242 = vrot.lane.b32.xlu2 %v2352_v56, %s1954_s19 }
 0xdc2   :  { %v1039_v43 = vpop.permute.xlu1 %1038 }
 0xdc3   :  { %1066 = vmatpush.msra.mxu2 %v1039_v43  ;;  %v1407_v43 = vld [vmem:[%s2590_s1 + $0x198] sm:$0xff] }
 0xdc4   :  { %1240 = vrot.lane.b32.xlu0 %v2346_v36, %s1954_s19  ;;  %1432 = vmatpush.msra.mxu1 %v1407_v43  ;;  %v1618_v43 = vld [vmem:[%s2590_s1 + $0x220] sm:$0xff] }
 0xdc5   :  { %1637 = vmatpush.msra.mxu3 %v1618_v43 }
 0xdc8   :  { %1343 = vrot.lane.b32.xlu1 %v2352_v56, %s1955_s20  ;;  %v1217_v56 = vadd.f32 %v2403_v12, %v1215_v60  ;;  %v1809_v60 = vld [vmem:[%s2590_s1 + $0x1b8] ss:$0 sm:$0xff] }
 0xdcc   :  { %1341 = vrot.lane.b32.xlu0 %v2346_v36, %s1955_s20  ;;  %v1221_v36 = vsel %vm247_vm12, %v1217_v56, -inf }
 0xde6   :  { %1332 = vadd.xlane.f32.xlu2 %v1331_v8 }
 0xdee   :  { %1323 = vmax.xlane.f32.xlu2 %v1322_v10 }
 0xdf6   :  { %1222 = vmax.xlane.f32.xlu0 %v1221_v36 }
 0xe10   :  { %v1030_v11 = vpop.xlane.xlu2 %1029 }
 0xe11   :  { %1882 = vrcp.f32 %v1030_v11 }
 0xe17   :  { %v1883_v13 = vpop.eup %1882 }
 0xe18   :  { %v1036_v15 = vmul.f32 %v1883_v13, %v1871_v44  ;;  %v1033_v21 = vpop.xlane.xlu2 %1032 }
 0xe19   :  { %1884 = vrcp.f32 %v1033_v21 }
 0xe1a   :  { %v1131_v16 = vpop.xlane.xlu1 %1130  ;;  %1752 = vmatmul.msk.f32.vlgmr.msra.gmra.mxu2 %vm243_vm11, %v1036_v15 }
 0xe1b   :  { %1886 = vrcp.f32 %v1131_v16 }
 0xe1f   :  { %v1885_v17 = vpop.eup %1884 }
 0xe20   :  { %v1243_v18 = vpop.permute.xlu2 %1242  ;;  %v1037_v19 = vmul.f32 %v1885_v17, %v1873_v51 }
 0xe21   :  { %v1887_v20 = vpop.eup %1886  ;;  %1765 = vmatpush.msk.msrb.mxu2 %vm278_vm13, %v1243_v18 }
 0xe22   :  { %v1137_v12 = vmul.f32 %v1887_v20, %v1875_v55  ;;  %1753 = vmatmul.msk.f32.gmra.mxu2 %vm243_vm11, %v1037_v19  ;;  %v1232_v25 = vpop.xlane.xlu1 %1231 }
 0xe23   :  { %v1134_v22 = vpop.xlane.xlu0 %1133 }
 0xe24   :  { %1888 = vrcp.f32 %v1134_v22  ;;  %1759 = vmatmul.msk.f32.vlgmr.msrb.gmra.mxu0 %vm243_vm11, %v1137_v12 }
 0xe25   :  { %1890 = vrcp.f32 %v1232_v25 }
 0xe2a   :  { %v1889_v24 = vpop.eup %1888 }
 0xe2b   :  { %v1138_v26 = vmul.f32 %v1889_v24, %v1879_v62  ;;  %v1891_v27 = vpop.eup %1890 }
 0xe2c   :  { %v1238_v29 = vmul.f32 %v1891_v27, %v1877_v33 }
 0xe2d   :  { %1760 = vmatmul.msk.f32.gmra.mxu0 %vm243_vm11, %v1138_v26 }
 0xe36   :  { %v1241_v30 = vpop.permute.xlu0 %1240 }
 0xe37   :  { %1268 = vmatpush.msrb.mxu2 %v1241_v30  ;;  %v1500_v30 = vld [vmem:[%s2590_s1 + $0x1e0] sm:$0xff] }
 0xe38   :  { %1766 = vmatmul.msk.f32.vlgmr.msrb.gmra.mxu2 %vm243_vm11, %v1238_v29  ;;  %v1501_v29 = vld [vmem:[%s2590_s1 + $0x1e8] sm:$0xff] }
 0xe39   :  { %1522 = vmatpush.msra.mxu2 %v1501_v29 }
 0xe3a   :  { %v1344_v31 = vpop.permute.xlu1 %1343 }
 0xe3b   :  { %1772 = vmatpush.msk.msra.mxu0 %vm278_vm13, %v1344_v31  ;;  %1523 = vmatpush.msra.mxu2 %v1500_v30  ;;  %v1499_v31 = vld [vmem:[%s2590_s1 + $0x1d8] sm:$0xff] }
 0xe3d   :  { %1524 = vmatpush.msra.mxu2 %v1499_v31 }
 0xe3e   :  { %v1342_v34 = vpop.permute.xlu0 %1341 }
 0xe3f   :  { %1369 = vmatpush.msra.mxu0 %v1342_v34 }
 0xe59   :  { %v1333_v35 = vpop.xlane.xlu2 %1332 }
 0xe5a   :  { %1892 = vrcp.f32 %v1333_v35 }
 0xe60   :  { %v1893_v38 = vpop.eup %1892 }
 0xe61   :  { %v1339_v39 = vmul.f32 %v1893_v38, %v1881_v6  ;;  %v1324_v41 = vpop.xlane.xlu2 %1323 }
 0xe62   :  { %v1326_v42 = vsub.f32 %v1318_v9, %v1324_v41 }
 0xe63   :  { %1773 = vmatmul.msk.f32.vlgmr.msra.gmra.mxu0 %vm243_vm11, %v1339_v39 }
 0xe64   :  { %v1329_v44 = vmul.f32 1.442695, %v1326_v42 }
 0xe66   :  { %1894 = vpow2.f32 %v1329_v44 }
 0xe69   :  { %v1223_v45 = vpop.xlane.xlu0 %1222 }
 0xe6a   :  { %v1225_v46 = vsub.f32 %v1217_v56, %v1223_v45 }
 0xe6c   :  { %v1895_v47 = vpop.eup %1894  ;;  %v1228_v48 = vmul.f32 1.442695, %v1225_v46 }
 0xe6d   :  { %v1334_v49 = vsel %vm247_vm12, %v1895_v47, 0.0 }
 0xe6e   :  { %1896 = vpow2.f32 %v1228_v48  ;;  %1335 = vadd.xlane.f32.xlu1 %v1334_v49 }
 0xe74   :  { %v1897_v50 = vpop.eup %1896 }
 0xe75   :  { %v1233_v51 = vsel %vm247_vm12, %v1897_v50, 0.0 }
 0xe76   :  { %1234 = vadd.xlane.f32.xlu2 %v1233_v51 }
 0xe9d   :  { %v1068_v53 = vpop.f32.mrf.mxu2 }
 0xea1   :  { %v1169_v52 = vpop.f32.mrf.mxu0 }
 0xea2   :  { %1379 = vrot.lane.b32.xlu2 %v1169_v52, %s1956_s0 }
 0xea5   :  { %v1071_v54 = vpop.f32.mrf.mxu2 }
 0xeaa   :  { %v1172_v37 = vpop.f32.mrf.mxu0 }
 0xebb   :  { %v1270_v55 = vpop.f32.mrf.mxu2 }
 0xebc   :  { %1387 = vrot.lane.b32.xlu0 %v1270_v55, %s1958_s22 }
 0xee0   :  { %v1371_v58 = vpop.f32.mrf.mxu0 }
 0xee1   :  { %1395 = vrot.lane.b32.xlu2 %v1371_v58, %s1957_s21  ;;  %v1336_v59 = vpop.xlane.xlu1 %1335 }
 0xee2   :  { %1898 = vrcp.f32 %v1336_v59  ;;  %v2526_v59 = vld [vmem:[%s2590_s1 + $0x1f0] ss:$0 sm:$0xff] }
 0xee8   :  { %v1899_v61 = vpop.eup %1898 }
 0xee9   :  { %v1235_v33 = vpop.xlane.xlu2 %1234  ;;  %1381 = vrot.lane.b32.xlu2 %v1172_v37, %s1956_s0  ;;  %v1340_v62 = vmul.f32 %v1899_v61, %v1895_v47  ;;  %v2507_v47 = vld [vmem:[%s2590_s1 + $0x1c0] ss:$0 sm:$0xff] }
 0xeea   :  { %1900 = vrcp.f32 %v1235_v33 }
 0xeeb   :  { %1774 = vmatmul.msk.f32.gmra.mxu0 %vm243_vm11, %v1340_v62 }
 0xef0   :  { %v1901_v28 = vpop.eup %1900 }
 0xef1   :  { %v1239_v63 = vmul.f32 %v1901_v28, %v1897_v50  ;;  %v2512_v50 = vld [vmem:[%s2590_s1 + $0x1c8] ss:$0 sm:$0xff] }
 0xef3   :  { %1767 = vmatmul.msk.f32.gmra.mxu2 %vm243_vm11, %v1239_v63 }
 0xefc   :  { %v1380_v4 = vpop.permute.xlu2 %1379 }
 0xefd   :  { %v1401_v6 = vsel %vm207_vm10, %v1068_v53, %v1380_v4 }
 0xf2e   :  { %v1388_v5 = vpop.permute.xlu0 %1387 }
 0xf2f   :  { %v1403_v57 = vsel %vm633_vm14, %v1401_v6, %v1388_v5  ;;  %v1617_v5 = vld [vmem:[%s2590_s1 + $0x218] sm:$0xff] }
 0xf30   :  { %1638 = vmatpush.msra.mxu3 %v1617_v5 }
 0xf3b   :  { %v1396_v7 = vpop.permute.xlu2 %1395 }
 0xf3c   :  { %v1405_v8 = vsel %vm636_vm15, %v1403_v57, %v1396_v7  ;;  %v1616_v7 = vld [vmem:[%s2590_s1 + $0x210] sm:$0xff] }
 0xf3d   :  { %1775 = vmatmul.msk.f32.vlgmr.msra.gmra.mxu1 %vm74_vm1, %v1405_v8  ;;  %1639 = vmatpush.msra.mxu3 %v1616_v7 }
 0xf43   :  { %v1382_v13 = vpop.permute.xlu2 %1381 }
 0xf44   :  { %v1402_v15 = vsel %vm207_vm10, %v1071_v54, %v1382_v13 }
 0xf68   :  { %v1374_v9 = vpop.f32.mrf.mxu0 }
 0xf69   :  { %1397 = vrot.lane.b32.xlu2 %v1374_v9, %s1957_s21 }
 0xf76   :  { %v1273_v23 = vpop.f32.mrf.mxu2 }
 0xf77   :  { %1389 = vrot.lane.b32.xlu1 %v1273_v23, %s1958_s22  ;;  %v1615_v23 = vld [vmem:[%s2590_s1 + $0x208] sm:$0xff] }
 0xf78   :  { %1640 = vmatpush.msra.mxu3 %v1615_v23 }
 0xfba   :  { %v1434_v10 = vpop.f32.mrf.mxu1 }
 0xfbb   :  { %v1440_v56 = vadd.f32 %v1434_v10, %v2306_v1 }
 0xfbd   :  { %v2478_v36 = vadd.f32 %v1809_v60, %v1440_v56  ;;  %v1614_v56 = vld [vmem:[%s2590_s1 + $0x200] sm:$0xff] }
 0xfbe   :  { %1641 = vmatpush.msra.mxu3 %v1614_v56 }
 0xfbf   :  { %v1448_v11 = vsel %vm74_vm1, %v2478_v36, 0.0 }
 0xfc0   :  { %1449 = vadd.xlane.f32.xlu0 %v1448_v11 }
 0xfc3   :  { %v1398_v16 = vpop.permute.xlu2 %1397 }
 0xfe9   :  { %v1390_v21 = vpop.permute.xlu1 %1389 }
 0xfea   :  { %v1404_v17 = vsel %vm633_vm14, %v1402_v15, %v1390_v21  ;;  %v1613_v15 = vld [vmem:[%s2590_s1 + $0x1f8] sm:$0xff] }
 0xfeb   :  { %v1406_v18 = vsel %vm636_vm15, %v1404_v17, %v1398_v16  ;;  %1642 = vmatpush.msra.mxu3 %v1613_v15 }
 0xfec   :  { %1776 = vmatmul.msk.f32.gmra.mxu1 %vm74_vm1, %v1406_v18 }
0x1033   :  { %v1450_v19 = vpop.xlane.xlu0 %1449 }
0x1034   :  { %v1454_v1 = vmul.f32 %v1450_v19, %v2050_v40 }
0x1036   :  { %v1456_v20 = vsub.f32 %v2478_v36, %v1454_v1 }
0x1038   :  { %v1458_v12 = vmul.f32 %v1456_v20, %v1456_v20 }
0x103a   :  { %v1460_v22 = vsel %vm74_vm1, %v1458_v12, 0.0 }
0x103b   :  { %1461 = vadd.xlane.f32.xlu2 %v1460_v22 }
0x1069   :  { %v1437_v24 = vpop.f32.mrf.mxu1 }
0x106a   :  { %v1441_v25 = vadd.f32 %v1437_v24, %v2311_v3  ;;  %v1498_v3 = vld [vmem:[%s2590_s1 + $0x1d0] sm:$0xff] }
0x106b   :  { %1525 = vmatpush.msra.mxu2 %v1498_v3 }
0x106c   :  { %v1445_v26 = vadd.f32 %v1809_v60, %v1441_v25 }
0x106e   :  { %v1451_v27 = vsel %vm111_vm2, %v1445_v26, 0.0 }
0x106f   :  { %1452 = vadd.xlane.f32.xlu1 %v1451_v27 }
0x10ae   :  { %v1462_v34 = vpop.xlane.xlu2 %1461 }
0x10af   :  { %v1466_v35 = vmul.f32 %v1462_v34, %v2050_v40 }
0x10b1   :  { %v1468_v38 = vadd.f32 1e-12, %v1466_v35 }
0x10b3   :  { %1902 = vrsqrt.f32 %v1468_v38  ;;  %vm1476_vm11 = vweird.f32 %v1468_v38 }
0x10b9   :  { %v1903_v39 = vpop.eup %1902 }
0x10ba   :  { %v1471_v41 = vmul.f32 %v1903_v39, %v1468_v38  ;;  %vm1477_vm10 = vweird.f32 %v1903_v39 }
0x10bb   :  { %vm1478_vm12 = vmor %vm1476_vm11, %vm1477_vm10 }
0x10bc   :  { %v1472_v42 = vmul.f32 %v1903_v39, %v1471_v41 }
0x10be   :  { %v1473_v44 = vmul.f32 0.5, %v1472_v42 }
0x10c0   :  { %v1474_v45 = vsub.f32 1.5, %v1473_v44 }
0x10c2   :  { %v1475_v46 = vmul.f32 %v1903_v39, %v1474_v45 }
0x10c4   :  { %v1479_v48 = vsel %vm1478_vm12, %v1903_v39, %v1475_v46 }
0x10c5   :  { %v1490_v49 = vmul.f32 %v1479_v48, %v1456_v20 }
0x10c7   :  { %v1493_v51 = vmul.f32 %v2507_v47, %v1490_v49 }
0x10c9   :  { %v1496_v52 = vadd.f32 %v2512_v50, %v1493_v51 }
0x10cb   :  { %1777 = vmatmul.msk.f32.vlgmr.msra.gmra.mxu2 %vm74_vm1, %v1496_v52 }
0x10e2   :  { %v1453_v53 = vpop.xlane.xlu1 %1452 }
0x10e3   :  { %v1455_v54 = vmul.f32 %v1453_v53, %v2050_v40 }
0x10e5   :  { %v2518_v55 = vsub.f32 %v1445_v26, %v1455_v54 }
0x10e7   :  { %v1459_v37 = vmul.f32 %v2518_v55, %v2518_v55 }
0x10e9   :  { %v1463_v58 = vsel %vm111_vm2, %v1459_v37, 0.0 }
0x10ea   :  { %1464 = vadd.xlane.f32.xlu0 %v1463_v58 }
0x114e   :  { %v1527_v61 = vpop.f32.mrf.mxu2 }
0x114f   :  { %v2529_v33 = vadd.f32 %v2526_v59, %v1527_v61 }
0x1151   :  { %v2532_v62 = vmul.f32 0.70710677, %v2529_v33  ;;  %v1533_v54 = vmul.f32 0.5, %v2529_v33 }
0x1153   :  { %v1541_v28 = vand.u32 2147483647, %v2532_v62  ;;  %vm1537_vm8 = vcmp.ge.f32.partialorder %v2532_v62, 0.0  ;;  %v1813_v62 = vld [vmem:[%s2590_s1 + $0x238] ss:$0 sm:$0xff] }
0x1154   :  { %v1539_v52 = vsel %vm1537_vm8, 1.0, %v1959_v14 }
0x1155   :  { %v1543_v63 = vmul.f32 0.3275911, %v1541_v28  ;;  %v1595_v1 = vsub.f32 0.0, %v1541_v28 }
0x1157   :  { %v1545_v0 = vadd.f32 1.0, %v1543_v63  ;;  %v1597_v25 = vmul.f32 %v1595_v1, %v1541_v28 }
0x1159   :  { %1904 = vrcp.f32 %v1545_v0  ;;  %v1558_v10 = vand.u32 2147483648, %v1545_v0  ;;  %v1556_v13 = vand.u32 2147483647, %v1545_v0  ;;  %vm1552_vm14 = vweird.f32 %v1545_v0 }
0x115a   :  { %v1599_v31 = vmul.f32 1.442695, %v1597_v25 }
0x115b   :  { %v1559_v16 = vor.u32 1.1754944e-38, %v1558_v10  ;;  %vm1557_vm4 = vcmp.eq.f32.partialorder %v1556_v13, 8.507059e+37 }
0x115d   :  { %v1465_v4 = vpop.xlane.xlu0 %1464 }
0x115e   :  { %v1467_v6 = vmul.f32 %v1465_v4, %v2050_v40 }
0x115f   :  { %v1905_v57 = vpop.eup %1904 }
0x1160   :  { %v1548_v8 = vmul.f32 %v1905_v57, %v1545_v0  ;;  %v1469_v9 = vadd.f32 1e-12, %v1467_v6  ;;  %vm1553_vm13 = vweird.f32 %v1905_v57 }
0x1161   :  { %vm1554_vm15 = vmor %vm1552_vm14, %vm1553_vm13 }
0x1162   :  { %v1549_v60 = vsub.f32 1.0, %v1548_v8  ;;  %1906 = vrsqrt.f32 %v1469_v9  ;;  %vm1486_vm6 = vweird.f32 %v1469_v9 }
0x1163   :  { %1908 = vpow2.f32 %v1599_v31 }
0x1164   :  { %v1550_v11 = vmul.f32 %v1905_v57, %v1549_v60 }
0x1166   :  { %v1551_v21 = vadd.f32 %v1905_v57, %v1550_v11 }
0x1168   :  { %v1907_v17 = vpop.eup %1906  ;;  %v1555_v18 = vsel %vm1554_vm15, %v1905_v57, %v1551_v21 }
0x1169   :  { %v1560_v19 = vsel %vm1557_vm4, %v1559_v16, %v1555_v18  ;;  %v1481_v20 = vmul.f32 %v1907_v17, %v1469_v9  ;;  %vm1487_vm5 = vweird.f32 %v1907_v17  ;;  %v1909_v48 = vpop.eup %1908 }
0x116a   :  { %v1577_v12 = vmul.f32 1.0614054, %v1560_v19  ;;  %vm1488_vm7 = vmor %vm1486_vm6, %vm1487_vm5 }
0x116b   :  { %v1482_v22 = vmul.f32 %v1907_v17, %v1481_v20 }
0x116c   :  { %v1579_v24 = vadd.f32 -1.4531521, %v1577_v12 }
0x116d   :  { %v1483_v26 = vmul.f32 0.5, %v1482_v22 }
0x116e   :  { %v1581_v27 = vmul.f32 %v1579_v24, %v1560_v19 }
0x116f   :  { %v1484_v29 = vsub.f32 1.5, %v1483_v26 }
0x1170   :  { %v1583_v30 = vadd.f32 1.4214138, %v1581_v27 }
0x1171   :  { %v1485_v3 = vmul.f32 %v1907_v17, %v1484_v29 }
0x1172   :  { %v1585_v34 = vmul.f32 %v1583_v30, %v1560_v19 }
0x1173   :  { %v1489_v35 = vsel %vm1488_vm7, %v1907_v17, %v1485_v3 }
0x1174   :  { %v1587_v38 = vadd.f32 -0.28449672, %v1585_v34  ;;  %v1491_v39 = vmul.f32 %v1489_v35, %v2518_v55 }
0x1176   :  { %v1589_v41 = vmul.f32 %v1587_v38, %v1560_v19  ;;  %v1494_v42 = vmul.f32 %v2507_v47, %v1491_v39 }
0x1178   :  { %v1591_v44 = vadd.f32 0.2548296, %v1589_v41  ;;  %v1497_v45 = vadd.f32 %v2512_v50, %v1494_v42 }
0x117a   :  { %v1593_v46 = vmul.f32 %v1591_v44, %v1560_v19  ;;  %1778 = vmatmul.msk.f32.gmra.mxu2 %vm74_vm1, %v1497_v45  ;;  %vm1656_vm1 = vcmask 1040384  }
0x117c   :  { %v1603_v49 = vmul.f32 %v1909_v48, %v1593_v46 }
0x117e   :  { %v1605_v51 = vsub.f32 1.0, %v1603_v49 }
0x1180   :  { %v1607_v53 = vmul.f32 %v1605_v51, %v1539_v52  ;;  %v1814_v52 = vld [vmem:[%s2590_s1 + $0x240] ss:$0 sm:$0xff] }
0x1182   :  { %v1609_v55 = vadd.f32 1.0, %v1607_v53 }
0x1184   :  { %v1611_v37 = vmul.f32 %v1609_v55, %v1533_v54 }
0x1186   :  { %1779 = vmatmul.msk.f32.vlgmr.msra.gmra.mxu3 %vm30_vm0, %v1611_v37 }
0x11fd   :  { %v1530_v47 = vpop.f32.mrf.mxu2 }
0x11fe   :  { %v1531_v50 = vadd.f32 %v2526_v59, %v1530_v47 }
0x1200   :  { %v1536_v58 = vmul.f32 0.70710677, %v1531_v50  ;;  %v1534_v27 = vmul.f32 0.5, %v1531_v50 }
0x1202   :  { %v1542_v61 = vand.u32 2147483647, %v1536_v58  ;;  %vm1538_vm12 = vcmp.ge.f32.partialorder %v1536_v58, 0.0 }
0x1203   :  { %v1540_v25 = vsel %vm1538_vm12, 1.0, %v1959_v14 }
0x1204   :  { %v1544_v28 = vmul.f32 0.3275911, %v1542_v61 }
0x1206   :  { %v1546_v63 = vadd.f32 1.0, %v1544_v28 }
0x1208   :  { %1910 = vrcp.f32 %v1546_v63  ;;  %v1573_v57 = vand.u32 2147483648, %v1546_v63  ;;  %v1571_v8 = vand.u32 2147483647, %v1546_v63  ;;  %vm1567_vm3 = vweird.f32 %v1546_v63 }
0x1209   :  { %v1644_v0 = vpop.f32.mrf.mxu3 }
0x120a   :  { %v1649_v2 = vadd.f32 %v1644_v0, %v2478_v36  ;;  %v1574_v23 = vor.u32 1.1754944e-38, %v1573_v57  ;;  %vm1572_vm11 = vcmp.eq.f32.partialorder %v1571_v8, 8.507059e+37  ;;  %v1596_v36 = vsub.f32 0.0, %v1542_v61 }
0x120c   :  { %v1652_v33 = vadd.f32 %v1813_v62, %v1649_v2  ;;  %v1598_v13 = vmul.f32 %v1596_v36, %v1542_v61 }
0x120e   :  { %v1911_v32 = vpop.eup %1910  ;;  %v1654_v43 = vrot.slane %v1652_v33, 4  ;;  %v1601_v16 = vmul.f32 1.442695, %v1598_v13 }
0x120f   :  { %v1563_v4 = vmul.f32 %v1911_v32, %v1546_v63  ;;  %vm1568_vm9 = vweird.f32 %v1911_v32 }
0x1210   :  { %v1657_v5 = vsel %vm1656_vm1, %v1652_v33, %v1654_v43  ;;  %vm1569_vm10 = vmor %vm1567_vm3, %vm1568_vm9  ;;  %1912 = vpow2.f32 %v1601_v16 }
0x1211   :  { %v1564_v6 = vsub.f32 1.0, %v1563_v4  ;;  %v1660_v59 = vsel %vm111_vm2, %v1657_v5, 0.0 }
0x1212   :  { %1661 = vadd.xlane.f32.xlu2 %v1660_v59 }
0x1213   :  { %v1565_v7 = vmul.f32 %v1911_v32, %v1564_v6 }
0x1215   :  { %v1566_v9 = vadd.f32 %v1911_v32, %v1565_v7 }
0x1216   :  { %v1913_v12 = vpop.eup %1912 }
0x1217   :  { %v1570_v60 = vsel %vm1569_vm10, %v1911_v32, %v1566_v9 }
0x1218   :  { %v1575_v10 = vsel %vm1572_vm11, %v1574_v23, %v1570_v60 }
0x1219   :  { %v1578_v56 = vmul.f32 1.0614054, %v1575_v10 }
0x121b   :  { %v1580_v11 = vadd.f32 -1.4531521, %v1578_v56 }
0x121d   :  { %v1582_v15 = vmul.f32 %v1580_v11, %v1575_v10 }
0x121f   :  { %v1584_v21 = vadd.f32 1.4214138, %v1582_v15 }
0x1221   :  { %v1586_v17 = vmul.f32 %v1584_v21, %v1575_v10 }
0x1223   :  { %v1588_v18 = vadd.f32 -0.28449672, %v1586_v17 }
0x1225   :  { %v1590_v19 = vmul.f32 %v1588_v18, %v1575_v10 }
0x1227   :  { %v1592_v1 = vadd.f32 0.2548296, %v1590_v19 }
0x1229   :  { %v1594_v20 = vmul.f32 %v1592_v1, %v1575_v10 }
0x122b   :  { %v1604_v22 = vmul.f32 %v1913_v12, %v1594_v20 }
0x122d   :  { %v1606_v24 = vsub.f32 1.0, %v1604_v22 }
0x122f   :  { %v1608_v26 = vmul.f32 %v1606_v24, %v1540_v25 }
0x1231   :  { %v1610_v29 = vadd.f32 1.0, %v1608_v26 }
0x1233   :  { %v1612_v30 = vmul.f32 %v1610_v29, %v1534_v27 }
0x1235   :  { %1780 = vmatmul.msk.f32.gmra.mxu3 %vm30_vm0, %v1612_v30 }
0x1285   :  { %v1662_v31 = vpop.xlane.xlu2 %1661 }
0x1286   :  { %v1663_v3 = vmul.f32 %v1662_v31, %v2050_v40 }
0x1288   :  { %v1664_v34 = vsub.f32 %v1657_v5, %v1663_v3 }
0x128a   :  { %v1665_v35 = vmul.f32 %v1664_v34, %v1664_v34 }
0x128c   :  { %v1666_v38 = vsel %vm111_vm2, %v1665_v35, 0.0 }
0x128d   :  { %1667 = vadd.xlane.f32.xlu0 %v1666_v38 }
0x12b8   :  { %v1647_v39 = vpop.f32.mrf.mxu3 }
0x1300   :  { %v1668_v41 = vpop.xlane.xlu0 %1667 }
0x1301   :  { %v1669_v42 = vmul.f32 %v1668_v41, %v2050_v40  ;;  %v1815_v40 = vld [vmem:[%s2590_s1 + $0x248] ss:$0 sm:$0xff] }
0x1303   :  { %v1670_v44 = vadd.f32 1e-12, %v1669_v42 }
0x1305   :  { %1914 = vrsqrt.f32 %v1670_v44  ;;  %vm1677_vm13 = vweird.f32 %v1670_v44 }
0x130b   :  { %v1915_v14 = vpop.eup %1914 }
0x130c   :  { %v1672_v45 = vmul.f32 %v1915_v14, %v1670_v44  ;;  %vm1678_vm0 = vweird.f32 %v1915_v14 }
0x130d   :  { %vm1679_vm14 = vmor %vm1677_vm13, %vm1678_vm0 }
0x130e   :  { %v1673_v46 = vmul.f32 %v1915_v14, %v1672_v45 }
0x1310   :  { %v1674_v48 = vmul.f32 0.5, %v1673_v46 }
0x1312   :  { %v1675_v49 = vsub.f32 1.5, %v1674_v48 }
0x1314   :  { %v1676_v51 = vmul.f32 %v1915_v14, %v1675_v49 }
0x1316   :  { %v1680_v53 = vsel %vm1679_vm14, %v1915_v14, %v1676_v51 }
0x1317   :  { %v1681_v54 = vmul.f32 %v1680_v53, %v1664_v34 }
0x1319   :  { %v1683_v55 = vmul.f32 %v1814_v52, %v1681_v54 }
0x131b   :  { %v1685_v37 = vadd.f32 %v1815_v40, %v1683_v55 }
0x131d   :  { %1686 = vst.msk [vmem:[#allocation2] sm:$0x3] %vm111_vm2, %v1685_v37 }
0x131e   :  { %1697 = dma.vmem_to_hbm [thread:$0]  %s1693_s27, 32, %s1695_s30, [#allocation3]  }
0x131f   :  { %1942 = dma.done.wait [#allocation3], 32  }
0x1320   :  { %1943 = vsyncadd [#allocation3], 4294967264 }
0x1321   :  { %1702 = vsyncpa [#allocation3], 1 }

</bundles_post_ra>
